<compile_context>
chip_gen: v6e
topology: v6e:2x2x1
jax: 0.10.0
libtpu: 0.0.40
codegen_flags: <defaults>
</compile_context>

<pallas_src>
import math
import functools

import jax
import jax.numpy as jnp
from jax import lax
from jax.experimental import pallas as pl
from jax.experimental.pallas import tpu as pltpu


# bf16 on v6e/v7x for MXU throughput (accumulation stays f32 via preferred_element_type);
# f32 default keeps the numerical check below tight.
_MM_DTYPE = jnp.float32


def _mm(a, b):
    return jnp.dot(a.astype(_MM_DTYPE), b.astype(_MM_DTYPE),
                   preferred_element_type=jnp.float32)


def _layernorm(x, gamma, beta, eps=1e-5):
    mean = jnp.mean(x, axis=-1, keepdims=True)
    var = jnp.mean((x - mean) ** 2, axis=-1, keepdims=True)
    return (x - mean) * lax.rsqrt(var + eps) * gamma + beta


# Row indices inside the packed per-layer vector operand (each row is (1, E)).
_BQ, _BK, _BV, _BO, _B2, _G1, _BE1, _G2, _BE2 = range(9)
_NV = 9


# ---------------------------------------------------------------------------
# Fused encoder kernel: L x TELayer + final Linear(k, 1) over the seq axis.
# ---------------------------------------------------------------------------

def encoder_kernel(x_ref, wqkv_ref, wo_ref, w1b_ref, w2_ref, vec_ref, wout_ref,
                   o_ref, *, nhead):
    B, S, E = x_ref.shape
    L = wo_ref.shape[0]
    H = nhead
    dh = E // H
    BS = B * S

    # Fold batch into the sublane (row) axis: (B, S, E) -> (B*S, E).
    x = x_ref[...].reshape(BS, E)

    for l in range(L):                                   # static layer unroll
        v0 = l * _NV

        # ---- multi-head self attention (q = k = x since pos is None, value = x) ----
        # Three lane-aligned matmuls (weights pre-transposed, scale folded into wq/bq).
        q = _mm(x, wqkv_ref[3 * l + 0]) + vec_ref[v0 + _BQ]      # (BS, E)
        k = _mm(x, wqkv_ref[3 * l + 1]) + vec_ref[v0 + _BK]
        v = _mm(x, wqkv_ref[3 * l + 2]) + vec_ref[v0 + _BV]

        q3 = q.reshape(B, S, E)
        k3 = k.reshape(B, S, E)
        v3 = v.reshape(B, S, E)

        # Pack heads into the (leading) batch axis -> one score einsum, one softmax,
        # one value einsum for all heads.
        qh = jnp.concatenate([q3[..., h * dh:(h + 1) * dh] for h in range(H)], axis=0)
        kh = jnp.concatenate([k3[..., h * dh:(h + 1) * dh] for h in range(H)], axis=0)
        vh = jnp.concatenate([v3[..., h * dh:(h + 1) * dh] for h in range(H)], axis=0)

        s = jnp.einsum('bqd,bkd->bqk', qh, kh,
                       preferred_element_type=jnp.float32)        # (H*B, S, S)
        s = s - jnp.max(s, axis=-1, keepdims=True)
        p = jnp.exp(s)
        p = p / jnp.sum(p, axis=-1, keepdims=True)                 # exact softmax
        oh = jnp.einsum('bqk,bkd->bqd', p, vh,
                        preferred_element_type=jnp.float32)        # (H*B, S, dh)

        # Re-assemble heads on the lane axis and apply ONE K=E output projection.
        o = jnp.concatenate([oh[h * B:(h + 1) * B] for h in range(H)], axis=-1)
        attn = _mm(o.reshape(BS, E), wo_ref[l])                    # (BS, E)

        x = x + attn + vec_ref[v0 + _BO]                 # dropout1 == identity (eval)
        x = _layernorm(x, vec_ref[v0 + _G1], vec_ref[v0 + _BE1])

        # ---- feed-forward (b1 is packed as the last row of the w1 stack) ----
        w1b = w1b_ref[l]                                 # (E+1, F)
        hdn = jnp.maximum(_mm(x, w1b[:E, :]) + w1b[E:E + 1, :], 0.0)   # ReLU
        x = x + _mm(hdn, w2_ref[l]) + vec_ref[v0 + _B2]  # dropouts == identity
        x = _layernorm(x, vec_ref[v0 + _G2], vec_ref[v0 + _BE2])

    # ---- final Linear(k, 1) over the sequence axis: VPU weighted row-sum epilogue ----
    wext = wout_ref[...]                                 # (S+1, 1): [w_out ; b_out]
    y = x.reshape(B, S, E)
    out = jnp.sum(y * wext[:S][None, :, :], axis=1) + wext[S:S + 1, :]   # (B, E)
    o_ref[...] = out.reshape(B, 1, E)


# ---------------------------------------------------------------------------
# Wrapper: host-side weight packing / pre-transpose + single pallas_call.
# ---------------------------------------------------------------------------

def transformer_encoder(x, layer_params, w_out, b_out, *, nhead):
    B, S, E = x.shape
    L = len(layer_params)
    F = layer_params[0]["w1"].shape[0]
    dh = E // nhead
    scale = 1.0 / math.sqrt(dh)

    wqkv_rows, vec_rows, wo_rows, w1b_rows, w2_rows = [], [], [], [], []
    for p in layer_params:
        wq, wk, wv = jnp.split(p["wqkv"], 3, axis=0)     # torch layout (out, in)
        bq, bk, bv = jnp.split(p["bqkv"], 3, axis=-1)    # (1, E) each
        wqkv_rows += [wq.T * scale, wk.T, wv.T]          # pre-transposed, scale folded
        vec_rows += [bq * scale, bk, bv, p["bo"], p["b2"],
                     p["g1"], p["be1"], p["g2"], p["be2"]]
        wo_rows.append(p["wo"].T)                                        # (E, E)
        w1b_rows.append(jnp.concatenate([p["w1"].T, p["b1"].reshape(1, F)], axis=0))
        w2_rows.append(p["w2"].T)                                        # (F, E)

    wqkv_s = jnp.stack(wqkv_rows)                        # (3L, E, E)
    wo_t = jnp.stack(wo_rows)                            # (L, E, E)
    w1b = jnp.stack(w1b_rows)                            # (L, E+1, F)
    w2_t = jnp.stack(w2_rows)                            # (L, F, E)
    vecs = jnp.stack([r.reshape(1, E) for r in vec_rows])  # (9L, 1, E)
    wout_ext = jnp.concatenate([w_out.T, b_out.reshape(1, 1)], axis=0)   # (S+1, 1)

    # Advisory cost estimate for the XLA scheduler.
    BS, H = B * S, nhead
    flops = L * (3 * 2 * BS * E * E                      # q/k/v projections
                 + 2 * 2 * B * H * S * S * dh            # scores + attn*V
                 + 2 * BS * E * E                        # out-projection
                 + 2 * BS * E * F + 2 * BS * F * E       # FFN
                 ) + 2 * B * S * E                       # seq-linear epilogue
    transcendentals = L * (B * H * S * S + 2 * BS)       # softmax exp + LN rsqrt
    operands = (x, wqkv_s, wo_t, w1b, w2_t, vecs, wout_ext)
    bytes_accessed = sum(int(a.size) * a.dtype.itemsize for a in operands) + B * E * 4

    kernel = functools.partial(encoder_kernel, nhead=nhead)
    # Grid-less call: everything lives whole in VMEM (<1 MiB, fine even on v7x).
    return pl.pallas_call(
        kernel,
        out_shape=jax.ShapeDtypeStruct((B, 1, E), jnp.float32),
        in_specs=[pl.BlockSpec(memory_space=pltpu.MemorySpace.VMEM)] * len(operands),
        out_specs=pl.BlockSpec(memory_space=pltpu.MemorySpace.VMEM),
        compiler_params=pltpu.CompilerParams(vmem_limit_bytes=32 * 1024 * 1024),
        cost_estimate=pl.CostEstimate(flops=flops, transcendentals=transcendentals,
                                      bytes_accessed=bytes_accessed),
    )(*operands)


# ---------------------------------------------------------------------------
# Deterministic parameter init (PyTorch-like uniform fan-in init)
# ---------------------------------------------------------------------------

def init_layer_params(key, emb_dim, dim_forward):
    E, F = emb_dim, dim_forward
    ks = jax.random.split(key, 8)

    def u(k, shape, fan_in):
        bound = 1.0 / math.sqrt(fan_in)
        return jax.random.uniform(k, shape, jnp.float32, -bound, bound)

    return dict(
        wqkv=u(ks[0], (3 * E, E), E), bqkv=u(ks[1], (1, 3 * E), E),
        wo=u(ks[2], (E, E), E),       bo=u(ks[3], (1, E), E),
        w1=u(ks[4], (F, E), E),       b1=u(ks[5], (1, F), E),
        w2=u(ks[6], (E, F), F),       b2=u(ks[7], (1, E), F),
        g1=jnp.ones((1, E), jnp.float32), be1=jnp.zeros((1, E), jnp.float32),
        g2=jnp.ones((1, E), jnp.float32), be2=jnp.zeros((1, E), jnp.float32),
    )


# ---------------------------------------------------------------------------
# Pure-JAX reference (mirrors the PyTorch forward in eval mode)
# ---------------------------------------------------------------------------

def ref_forward(x, layer_params, w_out, b_out, nhead):
    def ln(z, g, b):
        m = z.mean(-1, keepdims=True)
        v = ((z - m) ** 2).mean(-1, keepdims=True)
        return (z - m) / jnp.sqrt(v + 1e-5) * g + b

    B, S, E = x.shape
    H, dh = nhead, E // nhead
    y = x
    for p in layer_params:
        qkv = y @ p["wqkv"].T + p["bqkv"]
        q, k, v = jnp.split(qkv, 3, axis=-1)
        qh = q.reshape(B, S, H, dh).transpose(0, 2, 1, 3)
        kh = k.reshape(B, S, H, dh).transpose(0, 2, 1, 3)
        vh = v.reshape(B, S, H, dh).transpose(0, 2, 1, 3)
        s = jnp.einsum("bhqd,bhkd->bhqk", qh, kh) / math.sqrt(dh)
        pr = jax.nn.softmax(s, axis=-1)
        o = jnp.einsum("bhqk,bhkd->bhqd", pr, vh).transpose(0, 2, 1, 3).reshape(B, S, E)
        x2 = o @ p["wo"].T + p["bo"]
        y = ln(y + x2, p["g1"], p["be1"])
        h1 = jax.nn.relu(y @ p["w1"].T + p["b1"])
        x2 = h1 @ p["w2"].T + p["b2"]
        y = ln(y + x2, p["g2"], p["be2"])
    yt = y.transpose(0, 2, 1)                    # (B, E, S)
    out = yt @ w_out.T + b_out                   # (B, E, 1)
    return out.transpose(0, 2, 1)                # (B, 1, E)


# ---------------------------------------------------------------------------

if __name__ == "__main__":
    # TransformerEncoder(emb_dim=32, nhead=4, num_layers=2, k=8), dim_forward=512
    B, K, E, H, L, F = 2, 8, 32, 4, 2, 512

    key = jax.random.PRNGKey(0)
    kx, *pkeys = jax.random.split(key, L + 3)
    x = jax.random.normal(kx, (B, K, E), jnp.float32)

    layer_params = [init_layer_params(pkeys[i], E, F) for i in range(L)]
    bound = 1.0 / math.sqrt(K)
    w_out = jax.random.uniform(pkeys[L], (1, K), jnp.float32, -bound, bound)
    b_out = jax.random.uniform(pkeys[L + 1], (1, 1), jnp.float32, -bound, bound)

    out = transformer_encoder(x, layer_params, w_out, b_out, nhead=H)
    out = jax.block_until_ready(out)

    ref = ref_forward(x, layer_params, w_out, b_out, H)
    assert out.shape == (B, 1, E), out.shape
    err = float(jnp.max(jnp.abs(out - ref)))
    assert jnp.allclose(out, ref, atol=1e-3, rtol=1e-3), err

    print("KERNEL_OK")
</pallas_src>

<mosaic_0001>
module attributes {stable_mosaic.version = 11 : i64} {
  func.func @encoder_kernel(%arg0: memref<2x8x32xf32, #tpu.memory_space<vmem>>, %arg1: memref<6x32x32xf32, #tpu.memory_space<vmem>>, %arg2: memref<2x32x32xf32, #tpu.memory_space<vmem>>, %arg3: memref<2x33x512xf32, #tpu.memory_space<vmem>>, %arg4: memref<2x512x32xf32, #tpu.memory_space<vmem>>, %arg5: memref<18x1x32xf32, #tpu.memory_space<vmem>>, %arg6: memref<9x1xf32, #tpu.memory_space<vmem>>, %arg7: memref<2x1x32xf32, #tpu.memory_space<vmem>>) attributes {dimension_semantics = [], scalar_prefetch = 0 : i64, scratch_operands = 0 : i64, tpu.core_type = #tpu.core_type<tc>} {
    %c0 = arith.constant 0 : index
    %c0_0 = arith.constant 0 : index
    %c0_1 = arith.constant 0 : index
    %0 = vector.load %arg0[%c0, %c0_0, %c0_1] : memref<2x8x32xf32, #tpu.memory_space<vmem>>, vector<2x8x32xf32>
    %1 = vector.shape_cast %0 : vector<2x8x32xf32> to vector<16x32xf32>
    %c0_2 = arith.constant 0 : index
    %c0_3 = arith.constant 0 : index
    %c0_4 = arith.constant 0 : index
    %2 = vector.load %arg1[%c0_2, %c0_3, %c0_4] : memref<6x32x32xf32, #tpu.memory_space<vmem>>, vector<1x32x32xf32>
    %3 = vector.shape_cast %2 : vector<1x32x32xf32> to vector<32x32xf32>
    %cst = arith.constant dense<0.000000e+00> : vector<16x32xf32>
    %4 = tpu.matmul %1, %3, %cst {dimension_numbers = #tpu.dot_dimension_numbers<[1], [0], [0], [1], [0, 0, 1, 1], [], []>} : vector<16x32xf32>, vector<32x32xf32>, vector<16x32xf32> -> vector<16x32xf32>
    %c0_5 = arith.constant 0 : index
    %c0_6 = arith.constant 0 : index
    %c0_7 = arith.constant 0 : index
    %5 = vector.load %arg5[%c0_5, %c0_6, %c0_7] : memref<18x1x32xf32, #tpu.memory_space<vmem>>, vector<1x1x32xf32>
    %6 = vector.shape_cast %5 : vector<1x1x32xf32> to vector<1x32xf32>
    %7 = vector.broadcast %6 : vector<1x32xf32> to vector<16x32xf32>
    %8 = arith.addf %4, %7 : vector<16x32xf32>
    %c1 = arith.constant 1 : index
    %c0_8 = arith.constant 0 : index
    %c0_9 = arith.constant 0 : index
    %9 = vector.load %arg1[%c1, %c0_8, %c0_9] : memref<6x32x32xf32, #tpu.memory_space<vmem>>, vector<1x32x32xf32>
    %10 = vector.shape_cast %9 : vector<1x32x32xf32> to vector<32x32xf32>
    %cst_10 = arith.constant dense<0.000000e+00> : vector<16x32xf32>
    %11 = tpu.matmul %1, %10, %cst_10 {dimension_numbers = #tpu.dot_dimension_numbers<[1], [0], [0], [1], [0, 0, 1, 1], [], []>} : vector<16x32xf32>, vector<32x32xf32>, vector<16x32xf32> -> vector<16x32xf32>
    %c1_11 = arith.constant 1 : index
    %c0_12 = arith.constant 0 : index
    %c0_13 = arith.constant 0 : index
    %12 = vector.load %arg5[%c1_11, %c0_12, %c0_13] : memref<18x1x32xf32, #tpu.memory_space<vmem>>, vector<1x1x32xf32>
    %13 = vector.shape_cast %12 : vector<1x1x32xf32> to vector<1x32xf32>
    %14 = vector.broadcast %13 : vector<1x32xf32> to vector<16x32xf32>
    %15 = arith.addf %11, %14 : vector<16x32xf32>
    %c2 = arith.constant 2 : index
    %c0_14 = arith.constant 0 : index
    %c0_15 = arith.constant 0 : index
    %16 = vector.load %arg1[%c2, %c0_14, %c0_15] : memref<6x32x32xf32, #tpu.memory_space<vmem>>, vector<1x32x32xf32>
    %17 = vector.shape_cast %16 : vector<1x32x32xf32> to vector<32x32xf32>
    %cst_16 = arith.constant dense<0.000000e+00> : vector<16x32xf32>
    %18 = tpu.matmul %1, %17, %cst_16 {dimension_numbers = #tpu.dot_dimension_numbers<[1], [0], [0], [1], [0, 0, 1, 1], [], []>} : vector<16x32xf32>, vector<32x32xf32>, vector<16x32xf32> -> vector<16x32xf32>
    %c2_17 = arith.constant 2 : index
    %c0_18 = arith.constant 0 : index
    %c0_19 = arith.constant 0 : index
    %19 = vector.load %arg5[%c2_17, %c0_18, %c0_19] : memref<18x1x32xf32, #tpu.memory_space<vmem>>, vector<1x1x32xf32>
    %20 = vector.shape_cast %19 : vector<1x1x32xf32> to vector<1x32xf32>
    %21 = vector.broadcast %20 : vector<1x32xf32> to vector<16x32xf32>
    %22 = arith.addf %18, %21 : vector<16x32xf32>
    %23 = vector.shape_cast %8 : vector<16x32xf32> to vector<2x8x32xf32>
    %24 = vector.shape_cast %15 : vector<16x32xf32> to vector<2x8x32xf32>
    %25 = vector.shape_cast %22 : vector<16x32xf32> to vector<2x8x32xf32>
    %26 = vector.extract_strided_slice %23 {offsets = [0, 0, 0], sizes = [2, 8, 8], strides = [1, 1, 1]} : vector<2x8x32xf32> to vector<2x8x8xf32>
    %27 = vector.extract_strided_slice %23 {offsets = [0, 0, 8], sizes = [2, 8, 8], strides = [1, 1, 1]} : vector<2x8x32xf32> to vector<2x8x8xf32>
    %28 = vector.extract_strided_slice %23 {offsets = [0, 0, 16], sizes = [2, 8, 8], strides = [1, 1, 1]} : vector<2x8x32xf32> to vector<2x8x8xf32>
    %29 = vector.extract_strided_slice %23 {offsets = [0, 0, 24], sizes = [2, 8, 8], strides = [1, 1, 1]} : vector<2x8x32xf32> to vector<2x8x8xf32>
    %30 = tpu.concatenate %26, %27, %28, %29 in 0 : vector<2x8x8xf32>, vector<2x8x8xf32>, vector<2x8x8xf32>, vector<2x8x8xf32> -> vector<8x8x8xf32>
    %31 = vector.extract_strided_slice %24 {offsets = [0, 0, 0], sizes = [2, 8, 8], strides = [1, 1, 1]} : vector<2x8x32xf32> to vector<2x8x8xf32>
    %32 = vector.extract_strided_slice %24 {offsets = [0, 0, 8], sizes = [2, 8, 8], strides = [1, 1, 1]} : vector<2x8x32xf32> to vector<2x8x8xf32>
    %33 = vector.extract_strided_slice %24 {offsets = [0, 0, 16], sizes = [2, 8, 8], strides = [1, 1, 1]} : vector<2x8x32xf32> to vector<2x8x8xf32>
    %34 = vector.extract_strided_slice %24 {offsets = [0, 0, 24], sizes = [2, 8, 8], strides = [1, 1, 1]} : vector<2x8x32xf32> to vector<2x8x8xf32>
    %35 = tpu.concatenate %31, %32, %33, %34 in 0 : vector<2x8x8xf32>, vector<2x8x8xf32>, vector<2x8x8xf32>, vector<2x8x8xf32> -> vector<8x8x8xf32>
    %36 = vector.extract_strided_slice %25 {offsets = [0, 0, 0], sizes = [2, 8, 8], strides = [1, 1, 1]} : vector<2x8x32xf32> to vector<2x8x8xf32>
    %37 = vector.extract_strided_slice %25 {offsets = [0, 0, 8], sizes = [2, 8, 8], strides = [1, 1, 1]} : vector<2x8x32xf32> to vector<2x8x8xf32>
    %38 = vector.extract_strided_slice %25 {offsets = [0, 0, 16], sizes = [2, 8, 8], strides = [1, 1, 1]} : vector<2x8x32xf32> to vector<2x8x8xf32>
    %39 = vector.extract_strided_slice %25 {offsets = [0, 0, 24], sizes = [2, 8, 8], strides = [1, 1, 1]} : vector<2x8x32xf32> to vector<2x8x8xf32>
    %40 = tpu.concatenate %36, %37, %38, %39 in 0 : vector<2x8x8xf32>, vector<2x8x8xf32>, vector<2x8x8xf32>, vector<2x8x8xf32> -> vector<8x8x8xf32>
    "tpu.trace_start"() <{level = 10 : i32, message = "bqd,bkd->bqk"}> : () -> ()
    %cst_20 = arith.constant dense<0.000000e+00> : vector<8x8x8xf32>
    %41 = tpu.matmul %30, %35, %cst_20 {dimension_numbers = #tpu.dot_dimension_numbers<[2], [2], [1], [1], [0, 0, 0, 1, 1, 1], [0], [0]>} : vector<8x8x8xf32>, vector<8x8x8xf32>, vector<8x8x8xf32> -> vector<8x8x8xf32>
    "tpu.trace_stop"() : () -> ()
    %cst_21 = arith.constant dense<0xFF800000> : vector<8x8xf32>
    %42 = vector.multi_reduction <maximumf>, %41, %cst_21 [2] : vector<8x8x8xf32> to vector<8x8xf32>
    %43 = vector.shape_cast %42 : vector<8x8xf32> to vector<8x8x1xf32>
    %44 = vector.broadcast %43 : vector<8x8x1xf32> to vector<8x8x8xf32>
    %45 = arith.subf %41, %44 : vector<8x8x8xf32>
    %46 = math.exp %45 : vector<8x8x8xf32>
    %cst_22 = arith.constant dense<0.000000e+00> : vector<8x8xf32>
    %47 = vector.multi_reduction <add>, %46, %cst_22 [2] : vector<8x8x8xf32> to vector<8x8xf32>
    %48 = vector.shape_cast %47 : vector<8x8xf32> to vector<8x8x1xf32>
    %49 = vector.broadcast %48 : vector<8x8x1xf32> to vector<8x8x8xf32>
    %50 = arith.divf %46, %49 : vector<8x8x8xf32>
    "tpu.trace_start"() <{level = 10 : i32, message = "bqk,bkd->bqd"}> : () -> ()
    %cst_23 = arith.constant dense<0.000000e+00> : vector<8x8x8xf32>
    %51 = tpu.matmul %50, %40, %cst_23 {dimension_numbers = #tpu.dot_dimension_numbers<[2], [1], [1], [2], [0, 0, 0, 1, 1, 2], [0], [0]>} : vector<8x8x8xf32>, vector<8x8x8xf32>, vector<8x8x8xf32> -> vector<8x8x8xf32>
    "tpu.trace_stop"() : () -> ()
    %52 = vector.extract_strided_slice %51 {offsets = [0, 0, 0], sizes = [2, 8, 8], strides = [1, 1, 1]} : vector<8x8x8xf32> to vector<2x8x8xf32>
    %53 = vector.extract_strided_slice %51 {offsets = [2, 0, 0], sizes = [2, 8, 8], strides = [1, 1, 1]} : vector<8x8x8xf32> to vector<2x8x8xf32>
    %54 = vector.extract_strided_slice %51 {offsets = [4, 0, 0], sizes = [2, 8, 8], strides = [1, 1, 1]} : vector<8x8x8xf32> to vector<2x8x8xf32>
    %55 = vector.extract_strided_slice %51 {offsets = [6, 0, 0], sizes = [2, 8, 8], strides = [1, 1, 1]} : vector<8x8x8xf32> to vector<2x8x8xf32>
    %56 = tpu.concatenate %52, %53, %54, %55 in 2 : vector<2x8x8xf32>, vector<2x8x8xf32>, vector<2x8x8xf32>, vector<2x8x8xf32> -> vector<2x8x32xf32>
    %57 = vector.shape_cast %56 : vector<2x8x32xf32> to vector<16x32xf32>
    %c0_24 = arith.constant 0 : index
    %c0_25 = arith.constant 0 : index
    %c0_26 = arith.constant 0 : index
    %58 = vector.load %arg2[%c0_24, %c0_25, %c0_26] : memref<2x32x32xf32, #tpu.memory_space<vmem>>, vector<1x32x32xf32>
    %59 = vector.shape_cast %58 : vector<1x32x32xf32> to vector<32x32xf32>
    %cst_27 = arith.constant dense<0.000000e+00> : vector<16x32xf32>
    %60 = tpu.matmul %57, %59, %cst_27 {dimension_numbers = #tpu.dot_dimension_numbers<[1], [0], [0], [1], [0, 0, 1, 1], [], []>} : vector<16x32xf32>, vector<32x32xf32>, vector<16x32xf32> -> vector<16x32xf32>
    %61 = arith.addf %1, %60 : vector<16x32xf32>
    %c3 = arith.constant 3 : index
    %c0_28 = arith.constant 0 : index
    %c0_29 = arith.constant 0 : index
    %62 = vector.load %arg5[%c3, %c0_28, %c0_29] : memref<18x1x32xf32, #tpu.memory_space<vmem>>, vector<1x1x32xf32>
    %63 = vector.shape_cast %62 : vector<1x1x32xf32> to vector<1x32xf32>
    %64 = vector.broadcast %63 : vector<1x32xf32> to vector<16x32xf32>
    %65 = arith.addf %61, %64 : vector<16x32xf32>
    %c5 = arith.constant 5 : index
    %c0_30 = arith.constant 0 : index
    %c0_31 = arith.constant 0 : index
    %66 = vector.load %arg5[%c5, %c0_30, %c0_31] : memref<18x1x32xf32, #tpu.memory_space<vmem>>, vector<1x1x32xf32>
    %67 = vector.shape_cast %66 : vector<1x1x32xf32> to vector<1x32xf32>
    %c6 = arith.constant 6 : index
    %c0_32 = arith.constant 0 : index
    %c0_33 = arith.constant 0 : index
    %68 = vector.load %arg5[%c6, %c0_32, %c0_33] : memref<18x1x32xf32, #tpu.memory_space<vmem>>, vector<1x1x32xf32>
    %69 = vector.shape_cast %68 : vector<1x1x32xf32> to vector<1x32xf32>
    %cst_34 = arith.constant dense<0.000000e+00> : vector<16xf32>
    %70 = vector.multi_reduction <add>, %65, %cst_34 [1] : vector<16x32xf32> to vector<16xf32>
    %71 = vector.shape_cast %70 : vector<16xf32> to vector<16x1xf32>
    %cst_35 = arith.constant 3.200000e+01 : f32
    %72 = vector.broadcast %cst_35 : f32 to vector<16x1xf32>
    %73 = arith.divf %71, %72 : vector<16x1xf32>
    %74 = vector.broadcast %73 : vector<16x1xf32> to vector<16x32xf32>
    %75 = arith.subf %65, %74 : vector<16x32xf32>
    %76 = arith.mulf %75, %75 : vector<16x32xf32>
    %cst_36 = arith.constant dense<0.000000e+00> : vector<16xf32>
    %77 = vector.multi_reduction <add>, %76, %cst_36 [1] : vector<16x32xf32> to vector<16xf32>
    %78 = vector.shape_cast %77 : vector<16xf32> to vector<16x1xf32>
    %cst_37 = arith.constant 3.200000e+01 : f32
    %79 = vector.broadcast %cst_37 : f32 to vector<16x1xf32>
    %80 = arith.divf %78, %79 : vector<16x1xf32>
    %81 = vector.broadcast %73 : vector<16x1xf32> to vector<16x32xf32>
    %82 = arith.subf %65, %81 : vector<16x32xf32>
    %cst_38 = arith.constant 9.99999974E-6 : f32
    %83 = vector.broadcast %cst_38 : f32 to vector<16x1xf32>
    %84 = arith.addf %80, %83 : vector<16x1xf32>
    %85 = math.rsqrt %84 : vector<16x1xf32>
    %86 = vector.broadcast %85 : vector<16x1xf32> to vector<16x32xf32>
    %87 = arith.mulf %82, %86 : vector<16x32xf32>
    %88 = vector.broadcast %67 : vector<1x32xf32> to vector<16x32xf32>
    %89 = arith.mulf %87, %88 : vector<16x32xf32>
    %90 = vector.broadcast %69 : vector<1x32xf32> to vector<16x32xf32>
    %91 = arith.addf %89, %90 : vector<16x32xf32>
    %c0_39 = arith.constant 0 : index
    %c0_40 = arith.constant 0 : index
    %c0_41 = arith.constant 0 : index
    %92 = vector.load %arg3[%c0_39, %c0_40, %c0_41] : memref<2x33x512xf32, #tpu.memory_space<vmem>>, vector<1x33x512xf32>
    %93 = vector.shape_cast %92 : vector<1x33x512xf32> to vector<33x512xf32>
    %94 = vector.extract_strided_slice %93 {offsets = [0, 0], sizes = [32, 512], strides = [1, 1]} : vector<33x512xf32> to vector<32x512xf32>
    %cst_42 = arith.constant dense<0.000000e+00> : vector<16x512xf32>
    %95 = tpu.matmul %91, %94, %cst_42 {dimension_numbers = #tpu.dot_dimension_numbers<[1], [0], [0], [1], [0, 0, 1, 1], [], []>} : vector<16x32xf32>, vector<32x512xf32>, vector<16x512xf32> -> vector<16x512xf32>
    %96 = vector.extract_strided_slice %93 {offsets = [32, 0], sizes = [1, 512], strides = [1, 1]} : vector<33x512xf32> to vector<1x512xf32>
    %97 = vector.broadcast %96 : vector<1x512xf32> to vector<16x512xf32>
    %98 = arith.addf %95, %97 : vector<16x512xf32>
    %cst_43 = arith.constant 0.000000e+00 : f32
    %99 = vector.broadcast %cst_43 : f32 to vector<16x512xf32>
    %100 = arith.maximumf %98, %99 : vector<16x512xf32>
    %c0_44 = arith.constant 0 : index
    %c0_45 = arith.constant 0 : index
    %c0_46 = arith.constant 0 : index
    %101 = vector.load %arg4[%c0_44, %c0_45, %c0_46] : memref<2x512x32xf32, #tpu.memory_space<vmem>>, vector<1x512x32xf32>
    %102 = vector.shape_cast %101 : vector<1x512x32xf32> to vector<512x32xf32>
    %cst_47 = arith.constant dense<0.000000e+00> : vector<16x32xf32>
    %103 = tpu.matmul %100, %102, %cst_47 {dimension_numbers = #tpu.dot_dimension_numbers<[1], [0], [0], [1], [0, 0, 1, 1], [], []>} : vector<16x512xf32>, vector<512x32xf32>, vector<16x32xf32> -> vector<16x32xf32>
    %104 = arith.addf %91, %103 : vector<16x32xf32>
    %c4 = arith.constant 4 : index
    %c0_48 = arith.constant 0 : index
    %c0_49 = arith.constant 0 : index
    %105 = vector.load %arg5[%c4, %c0_48, %c0_49] : memref<18x1x32xf32, #tpu.memory_space<vmem>>, vector<1x1x32xf32>
    %106 = vector.shape_cast %105 : vector<1x1x32xf32> to vector<1x32xf32>
    %107 = vector.broadcast %106 : vector<1x32xf32> to vector<16x32xf32>
    %108 = arith.addf %104, %107 : vector<16x32xf32>
    %c7 = arith.constant 7 : index
    %c0_50 = arith.constant 0 : index
    %c0_51 = arith.constant 0 : index
    %109 = vector.load %arg5[%c7, %c0_50, %c0_51] : memref<18x1x32xf32, #tpu.memory_space<vmem>>, vector<1x1x32xf32>
    %110 = vector.shape_cast %109 : vector<1x1x32xf32> to vector<1x32xf32>
    %c8 = arith.constant 8 : index
    %c0_52 = arith.constant 0 : index
    %c0_53 = arith.constant 0 : index
    %111 = vector.load %arg5[%c8, %c0_52, %c0_53] : memref<18x1x32xf32, #tpu.memory_space<vmem>>, vector<1x1x32xf32>
    %112 = vector.shape_cast %111 : vector<1x1x32xf32> to vector<1x32xf32>
    %cst_54 = arith.constant dense<0.000000e+00> : vector<16xf32>
    %113 = vector.multi_reduction <add>, %108, %cst_54 [1] : vector<16x32xf32> to vector<16xf32>
    %114 = vector.shape_cast %113 : vector<16xf32> to vector<16x1xf32>
    %cst_55 = arith.constant 3.200000e+01 : f32
    %115 = vector.broadcast %cst_55 : f32 to vector<16x1xf32>
    %116 = arith.divf %114, %115 : vector<16x1xf32>
    %117 = vector.broadcast %116 : vector<16x1xf32> to vector<16x32xf32>
    %118 = arith.subf %108, %117 : vector<16x32xf32>
    %119 = arith.mulf %118, %118 : vector<16x32xf32>
    %cst_56 = arith.constant dense<0.000000e+00> : vector<16xf32>
    %120 = vector.multi_reduction <add>, %119, %cst_56 [1] : vector<16x32xf32> to vector<16xf32>
    %121 = vector.shape_cast %120 : vector<16xf32> to vector<16x1xf32>
    %cst_57 = arith.constant 3.200000e+01 : f32
    %122 = vector.broadcast %cst_57 : f32 to vector<16x1xf32>
    %123 = arith.divf %121, %122 : vector<16x1xf32>
    %124 = vector.broadcast %116 : vector<16x1xf32> to vector<16x32xf32>
    %125 = arith.subf %108, %124 : vector<16x32xf32>
    %cst_58 = arith.constant 9.99999974E-6 : f32
    %126 = vector.broadcast %cst_58 : f32 to vector<16x1xf32>
    %127 = arith.addf %123, %126 : vector<16x1xf32>
    %128 = math.rsqrt %127 : vector<16x1xf32>
    %129 = vector.broadcast %128 : vector<16x1xf32> to vector<16x32xf32>
    %130 = arith.mulf %125, %129 : vector<16x32xf32>
    %131 = vector.broadcast %110 : vector<1x32xf32> to vector<16x32xf32>
    %132 = arith.mulf %130, %131 : vector<16x32xf32>
    %133 = vector.broadcast %112 : vector<1x32xf32> to vector<16x32xf32>
    %134 = arith.addf %132, %133 : vector<16x32xf32>
    %c3_59 = arith.constant 3 : index
    %c0_60 = arith.constant 0 : index
    %c0_61 = arith.constant 0 : index
    %135 = vector.load %arg1[%c3_59, %c0_60, %c0_61] : memref<6x32x32xf32, #tpu.memory_space<vmem>>, vector<1x32x32xf32>
    %136 = vector.shape_cast %135 : vector<1x32x32xf32> to vector<32x32xf32>
    %cst_62 = arith.constant dense<0.000000e+00> : vector<16x32xf32>
    %137 = tpu.matmul %134, %136, %cst_62 {dimension_numbers = #tpu.dot_dimension_numbers<[1], [0], [0], [1], [0, 0, 1, 1], [], []>} : vector<16x32xf32>, vector<32x32xf32>, vector<16x32xf32> -> vector<16x32xf32>
    %c9 = arith.constant 9 : index
    %c0_63 = arith.constant 0 : index
    %c0_64 = arith.constant 0 : index
    %138 = vector.load %arg5[%c9, %c0_63, %c0_64] : memref<18x1x32xf32, #tpu.memory_space<vmem>>, vector<1x1x32xf32>
    %139 = vector.shape_cast %138 : vector<1x1x32xf32> to vector<1x32xf32>
    %140 = vector.broadcast %139 : vector<1x32xf32> to vector<16x32xf32>
    %141 = arith.addf %137, %140 : vector<16x32xf32>
    %c4_65 = arith.constant 4 : index
    %c0_66 = arith.constant 0 : index
    %c0_67 = arith.constant 0 : index
    %142 = vector.load %arg1[%c4_65, %c0_66, %c0_67] : memref<6x32x32xf32, #tpu.memory_space<vmem>>, vector<1x32x32xf32>
    %143 = vector.shape_cast %142 : vector<1x32x32xf32> to vector<32x32xf32>
    %cst_68 = arith.constant dense<0.000000e+00> : vector<16x32xf32>
    %144 = tpu.matmul %134, %143, %cst_68 {dimension_numbers = #tpu.dot_dimension_numbers<[1], [0], [0], [1], [0, 0, 1, 1], [], []>} : vector<16x32xf32>, vector<32x32xf32>, vector<16x32xf32> -> vector<16x32xf32>
    %c10 = arith.constant 10 : index
    %c0_69 = arith.constant 0 : index
    %c0_70 = arith.constant 0 : index
    %145 = vector.load %arg5[%c10, %c0_69, %c0_70] : memref<18x1x32xf32, #tpu.memory_space<vmem>>, vector<1x1x32xf32>
    %146 = vector.shape_cast %145 : vector<1x1x32xf32> to vector<1x32xf32>
    %147 = vector.broadcast %146 : vector<1x32xf32> to vector<16x32xf32>
    %148 = arith.addf %144, %147 : vector<16x32xf32>
    %c5_71 = arith.constant 5 : index
    %c0_72 = arith.constant 0 : index
    %c0_73 = arith.constant 0 : index
    %149 = vector.load %arg1[%c5_71, %c0_72, %c0_73] : memref<6x32x32xf32, #tpu.memory_space<vmem>>, vector<1x32x32xf32>
    %150 = vector.shape_cast %149 : vector<1x32x32xf32> to vector<32x32xf32>
    %cst_74 = arith.constant dense<0.000000e+00> : vector<16x32xf32>
    %151 = tpu.matmul %134, %150, %cst_74 {dimension_numbers = #tpu.dot_dimension_numbers<[1], [0], [0], [1], [0, 0, 1, 1], [], []>} : vector<16x32xf32>, vector<32x32xf32>, vector<16x32xf32> -> vector<16x32xf32>
    %c11 = arith.constant 11 : index
    %c0_75 = arith.constant 0 : index
    %c0_76 = arith.constant 0 : index
    %152 = vector.load %arg5[%c11, %c0_75, %c0_76] : memref<18x1x32xf32, #tpu.memory_space<vmem>>, vector<1x1x32xf32>
    %153 = vector.shape_cast %152 : vector<1x1x32xf32> to vector<1x32xf32>
    %154 = vector.broadcast %153 : vector<1x32xf32> to vector<16x32xf32>
    %155 = arith.addf %151, %154 : vector<16x32xf32>
    %156 = vector.shape_cast %141 : vector<16x32xf32> to vector<2x8x32xf32>
    %157 = vector.shape_cast %148 : vector<16x32xf32> to vector<2x8x32xf32>
    %158 = vector.shape_cast %155 : vector<16x32xf32> to vector<2x8x32xf32>
    %159 = vector.extract_strided_slice %156 {offsets = [0, 0, 0], sizes = [2, 8, 8], strides = [1, 1, 1]} : vector<2x8x32xf32> to vector<2x8x8xf32>
    %160 = vector.extract_strided_slice %156 {offsets = [0, 0, 8], sizes = [2, 8, 8], strides = [1, 1, 1]} : vector<2x8x32xf32> to vector<2x8x8xf32>
    %161 = vector.extract_strided_slice %156 {offsets = [0, 0, 16], sizes = [2, 8, 8], strides = [1, 1, 1]} : vector<2x8x32xf32> to vector<2x8x8xf32>
    %162 = vector.extract_strided_slice %156 {offsets = [0, 0, 24], sizes = [2, 8, 8], strides = [1, 1, 1]} : vector<2x8x32xf32> to vector<2x8x8xf32>
    %163 = tpu.concatenate %159, %160, %161, %162 in 0 : vector<2x8x8xf32>, vector<2x8x8xf32>, vector<2x8x8xf32>, vector<2x8x8xf32> -> vector<8x8x8xf32>
    %164 = vector.extract_strided_slice %157 {offsets = [0, 0, 0], sizes = [2, 8, 8], strides = [1, 1, 1]} : vector<2x8x32xf32> to vector<2x8x8xf32>
    %165 = vector.extract_strided_slice %157 {offsets = [0, 0, 8], sizes = [2, 8, 8], strides = [1, 1, 1]} : vector<2x8x32xf32> to vector<2x8x8xf32>
    %166 = vector.extract_strided_slice %157 {offsets = [0, 0, 16], sizes = [2, 8, 8], strides = [1, 1, 1]} : vector<2x8x32xf32> to vector<2x8x8xf32>
    %167 = vector.extract_strided_slice %157 {offsets = [0, 0, 24], sizes = [2, 8, 8], strides = [1, 1, 1]} : vector<2x8x32xf32> to vector<2x8x8xf32>
    %168 = tpu.concatenate %164, %165, %166, %167 in 0 : vector<2x8x8xf32>, vector<2x8x8xf32>, vector<2x8x8xf32>, vector<2x8x8xf32> -> vector<8x8x8xf32>
    %169 = vector.extract_strided_slice %158 {offsets = [0, 0, 0], sizes = [2, 8, 8], strides = [1, 1, 1]} : vector<2x8x32xf32> to vector<2x8x8xf32>
    %170 = vector.extract_strided_slice %158 {offsets = [0, 0, 8], sizes = [2, 8, 8], strides = [1, 1, 1]} : vector<2x8x32xf32> to vector<2x8x8xf32>
    %171 = vector.extract_strided_slice %158 {offsets = [0, 0, 16], sizes = [2, 8, 8], strides = [1, 1, 1]} : vector<2x8x32xf32> to vector<2x8x8xf32>
    %172 = vector.extract_strided_slice %158 {offsets = [0, 0, 24], sizes = [2, 8, 8], strides = [1, 1, 1]} : vector<2x8x32xf32> to vector<2x8x8xf32>
    %173 = tpu.concatenate %169, %170, %171, %172 in 0 : vector<2x8x8xf32>, vector<2x8x8xf32>, vector<2x8x8xf32>, vector<2x8x8xf32> -> vector<8x8x8xf32>
    "tpu.trace_start"() <{level = 10 : i32, message = "bqd,bkd->bqk"}> : () -> ()
    %cst_77 = arith.constant dense<0.000000e+00> : vector<8x8x8xf32>
    %174 = tpu.matmul %163, %168, %cst_77 {dimension_numbers = #tpu.dot_dimension_numbers<[2], [2], [1], [1], [0, 0, 0, 1, 1, 1], [0], [0]>} : vector<8x8x8xf32>, vector<8x8x8xf32>, vector<8x8x8xf32> -> vector<8x8x8xf32>
    "tpu.trace_stop"() : () -> ()
    %cst_78 = arith.constant dense<0xFF800000> : vector<8x8xf32>
    %175 = vector.multi_reduction <maximumf>, %174, %cst_78 [2] : vector<8x8x8xf32> to vector<8x8xf32>
    %176 = vector.shape_cast %175 : vector<8x8xf32> to vector<8x8x1xf32>
    %177 = vector.broadcast %176 : vector<8x8x1xf32> to vector<8x8x8xf32>
    %178 = arith.subf %174, %177 : vector<8x8x8xf32>
    %179 = math.exp %178 : vector<8x8x8xf32>
    %cst_79 = arith.constant dense<0.000000e+00> : vector<8x8xf32>
    %180 = vector.multi_reduction <add>, %179, %cst_79 [2] : vector<8x8x8xf32> to vector<8x8xf32>
    %181 = vector.shape_cast %180 : vector<8x8xf32> to vector<8x8x1xf32>
    %182 = vector.broadcast %181 : vector<8x8x1xf32> to vector<8x8x8xf32>
    %183 = arith.divf %179, %182 : vector<8x8x8xf32>
    "tpu.trace_start"() <{level = 10 : i32, message = "bqk,bkd->bqd"}> : () -> ()
    %cst_80 = arith.constant dense<0.000000e+00> : vector<8x8x8xf32>
    %184 = tpu.matmul %183, %173, %cst_80 {dimension_numbers = #tpu.dot_dimension_numbers<[2], [1], [1], [2], [0, 0, 0, 1, 1, 2], [0], [0]>} : vector<8x8x8xf32>, vector<8x8x8xf32>, vector<8x8x8xf32> -> vector<8x8x8xf32>
    "tpu.trace_stop"() : () -> ()
    %185 = vector.extract_strided_slice %184 {offsets = [0, 0, 0], sizes = [2, 8, 8], strides = [1, 1, 1]} : vector<8x8x8xf32> to vector<2x8x8xf32>
    %186 = vector.extract_strided_slice %184 {offsets = [2, 0, 0], sizes = [2, 8, 8], strides = [1, 1, 1]} : vector<8x8x8xf32> to vector<2x8x8xf32>
    %187 = vector.extract_strided_slice %184 {offsets = [4, 0, 0], sizes = [2, 8, 8], strides = [1, 1, 1]} : vector<8x8x8xf32> to vector<2x8x8xf32>
    %188 = vector.extract_strided_slice %184 {offsets = [6, 0, 0], sizes = [2, 8, 8], strides = [1, 1, 1]} : vector<8x8x8xf32> to vector<2x8x8xf32>
    %189 = tpu.concatenate %185, %186, %187, %188 in 2 : vector<2x8x8xf32>, vector<2x8x8xf32>, vector<2x8x8xf32>, vector<2x8x8xf32> -> vector<2x8x32xf32>
    %190 = vector.shape_cast %189 : vector<2x8x32xf32> to vector<16x32xf32>
    %c1_81 = arith.constant 1 : index
    %c0_82 = arith.constant 0 : index
    %c0_83 = arith.constant 0 : index
    %191 = vector.load %arg2[%c1_81, %c0_82, %c0_83] : memref<2x32x32xf32, #tpu.memory_space<vmem>>, vector<1x32x32xf32>
    %192 = vector.shape_cast %191 : vector<1x32x32xf32> to vector<32x32xf32>
    %cst_84 = arith.constant dense<0.000000e+00> : vector<16x32xf32>
    %193 = tpu.matmul %190, %192, %cst_84 {dimension_numbers = #tpu.dot_dimension_numbers<[1], [0], [0], [1], [0, 0, 1, 1], [], []>} : vector<16x32xf32>, vector<32x32xf32>, vector<16x32xf32> -> vector<16x32xf32>
    %194 = arith.addf %134, %193 : vector<16x32xf32>
    %c12 = arith.constant 12 : index
    %c0_85 = arith.constant 0 : index
    %c0_86 = arith.constant 0 : index
    %195 = vector.load %arg5[%c12, %c0_85, %c0_86] : memref<18x1x32xf32, #tpu.memory_space<vmem>>, vector<1x1x32xf32>
    %196 = vector.shape_cast %195 : vector<1x1x32xf32> to vector<1x32xf32>
    %197 = vector.broadcast %196 : vector<1x32xf32> to vector<16x32xf32>
    %198 = arith.addf %194, %197 : vector<16x32xf32>
    %c14 = arith.constant 14 : index
    %c0_87 = arith.constant 0 : index
    %c0_88 = arith.constant 0 : index
    %199 = vector.load %arg5[%c14, %c0_87, %c0_88] : memref<18x1x32xf32, #tpu.memory_space<vmem>>, vector<1x1x32xf32>
    %200 = vector.shape_cast %199 : vector<1x1x32xf32> to vector<1x32xf32>
    %c15 = arith.constant 15 : index
    %c0_89 = arith.constant 0 : index
    %c0_90 = arith.constant 0 : index
    %201 = vector.load %arg5[%c15, %c0_89, %c0_90] : memref<18x1x32xf32, #tpu.memory_space<vmem>>, vector<1x1x32xf32>
    %202 = vector.shape_cast %201 : vector<1x1x32xf32> to vector<1x32xf32>
    %cst_91 = arith.constant dense<0.000000e+00> : vector<16xf32>
    %203 = vector.multi_reduction <add>, %198, %cst_91 [1] : vector<16x32xf32> to vector<16xf32>
    %204 = vector.shape_cast %203 : vector<16xf32> to vector<16x1xf32>
    %cst_92 = arith.constant 3.200000e+01 : f32
    %205 = vector.broadcast %cst_92 : f32 to vector<16x1xf32>
    %206 = arith.divf %204, %205 : vector<16x1xf32>
    %207 = vector.broadcast %206 : vector<16x1xf32> to vector<16x32xf32>
    %208 = arith.subf %198, %207 : vector<16x32xf32>
    %209 = arith.mulf %208, %208 : vector<16x32xf32>
    %cst_93 = arith.constant dense<0.000000e+00> : vector<16xf32>
    %210 = vector.multi_reduction <add>, %209, %cst_93 [1] : vector<16x32xf32> to vector<16xf32>
    %211 = vector.shape_cast %210 : vector<16xf32> to vector<16x1xf32>
    %cst_94 = arith.constant 3.200000e+01 : f32
    %212 = vector.broadcast %cst_94 : f32 to vector<16x1xf32>
    %213 = arith.divf %211, %212 : vector<16x1xf32>
    %214 = vector.broadcast %206 : vector<16x1xf32> to vector<16x32xf32>
    %215 = arith.subf %198, %214 : vector<16x32xf32>
    %cst_95 = arith.constant 9.99999974E-6 : f32
    %216 = vector.broadcast %cst_95 : f32 to vector<16x1xf32>
    %217 = arith.addf %213, %216 : vector<16x1xf32>
    %218 = math.rsqrt %217 : vector<16x1xf32>
    %219 = vector.broadcast %218 : vector<16x1xf32> to vector<16x32xf32>
    %220 = arith.mulf %215, %219 : vector<16x32xf32>
    %221 = vector.broadcast %200 : vector<1x32xf32> to vector<16x32xf32>
    %222 = arith.mulf %220, %221 : vector<16x32xf32>
    %223 = vector.broadcast %202 : vector<1x32xf32> to vector<16x32xf32>
    %224 = arith.addf %222, %223 : vector<16x32xf32>
    %c1_96 = arith.constant 1 : index
    %c0_97 = arith.constant 0 : index
    %c0_98 = arith.constant 0 : index
    %225 = vector.load %arg3[%c1_96, %c0_97, %c0_98] : memref<2x33x512xf32, #tpu.memory_space<vmem>>, vector<1x33x512xf32>
    %226 = vector.shape_cast %225 : vector<1x33x512xf32> to vector<33x512xf32>
    %227 = vector.extract_strided_slice %226 {offsets = [0, 0], sizes = [32, 512], strides = [1, 1]} : vector<33x512xf32> to vector<32x512xf32>
    %cst_99 = arith.constant dense<0.000000e+00> : vector<16x512xf32>
    %228 = tpu.matmul %224, %227, %cst_99 {dimension_numbers = #tpu.dot_dimension_numbers<[1], [0], [0], [1], [0, 0, 1, 1], [], []>} : vector<16x32xf32>, vector<32x512xf32>, vector<16x512xf32> -> vector<16x512xf32>
    %229 = vector.extract_strided_slice %226 {offsets = [32, 0], sizes = [1, 512], strides = [1, 1]} : vector<33x512xf32> to vector<1x512xf32>
    %230 = vector.broadcast %229 : vector<1x512xf32> to vector<16x512xf32>
    %231 = arith.addf %228, %230 : vector<16x512xf32>
    %cst_100 = arith.constant 0.000000e+00 : f32
    %232 = vector.broadcast %cst_100 : f32 to vector<16x512xf32>
    %233 = arith.maximumf %231, %232 : vector<16x512xf32>
    %c1_101 = arith.constant 1 : index
    %c0_102 = arith.constant 0 : index
    %c0_103 = arith.constant 0 : index
    %234 = vector.load %arg4[%c1_101, %c0_102, %c0_103] : memref<2x512x32xf32, #tpu.memory_space<vmem>>, vector<1x512x32xf32>
    %235 = vector.shape_cast %234 : vector<1x512x32xf32> to vector<512x32xf32>
    %cst_104 = arith.constant dense<0.000000e+00> : vector<16x32xf32>
    %236 = tpu.matmul %233, %235, %cst_104 {dimension_numbers = #tpu.dot_dimension_numbers<[1], [0], [0], [1], [0, 0, 1, 1], [], []>} : vector<16x512xf32>, vector<512x32xf32>, vector<16x32xf32> -> vector<16x32xf32>
    %237 = arith.addf %224, %236 : vector<16x32xf32>
    %c13 = arith.constant 13 : index
    %c0_105 = arith.constant 0 : index
    %c0_106 = arith.constant 0 : index
    %238 = vector.load %arg5[%c13, %c0_105, %c0_106] : memref<18x1x32xf32, #tpu.memory_space<vmem>>, vector<1x1x32xf32>
    %239 = vector.shape_cast %238 : vector<1x1x32xf32> to vector<1x32xf32>
    %240 = vector.broadcast %239 : vector<1x32xf32> to vector<16x32xf32>
    %241 = arith.addf %237, %240 : vector<16x32xf32>
    %c16 = arith.constant 16 : index
    %c0_107 = arith.constant 0 : index
    %c0_108 = arith.constant 0 : index
    %242 = vector.load %arg5[%c16, %c0_107, %c0_108] : memref<18x1x32xf32, #tpu.memory_space<vmem>>, vector<1x1x32xf32>
    %243 = vector.shape_cast %242 : vector<1x1x32xf32> to vector<1x32xf32>
    %c17 = arith.constant 17 : index
    %c0_109 = arith.constant 0 : index
    %c0_110 = arith.constant 0 : index
    %244 = vector.load %arg5[%c17, %c0_109, %c0_110] : memref<18x1x32xf32, #tpu.memory_space<vmem>>, vector<1x1x32xf32>
    %245 = vector.shape_cast %244 : vector<1x1x32xf32> to vector<1x32xf32>
    %cst_111 = arith.constant dense<0.000000e+00> : vector<16xf32>
    %246 = vector.multi_reduction <add>, %241, %cst_111 [1] : vector<16x32xf32> to vector<16xf32>
    %247 = vector.shape_cast %246 : vector<16xf32> to vector<16x1xf32>
    %cst_112 = arith.constant 3.200000e+01 : f32
    %248 = vector.broadcast %cst_112 : f32 to vector<16x1xf32>
    %249 = arith.divf %247, %248 : vector<16x1xf32>
    %250 = vector.broadcast %249 : vector<16x1xf32> to vector<16x32xf32>
    %251 = arith.subf %241, %250 : vector<16x32xf32>
    %252 = arith.mulf %251, %251 : vector<16x32xf32>
    %cst_113 = arith.constant dense<0.000000e+00> : vector<16xf32>
    %253 = vector.multi_reduction <add>, %252, %cst_113 [1] : vector<16x32xf32> to vector<16xf32>
    %254 = vector.shape_cast %253 : vector<16xf32> to vector<16x1xf32>
    %cst_114 = arith.constant 3.200000e+01 : f32
    %255 = vector.broadcast %cst_114 : f32 to vector<16x1xf32>
    %256 = arith.divf %254, %255 : vector<16x1xf32>
    %257 = vector.broadcast %249 : vector<16x1xf32> to vector<16x32xf32>
    %258 = arith.subf %241, %257 : vector<16x32xf32>
    %cst_115 = arith.constant 9.99999974E-6 : f32
    %259 = vector.broadcast %cst_115 : f32 to vector<16x1xf32>
    %260 = arith.addf %256, %259 : vector<16x1xf32>
    %261 = math.rsqrt %260 : vector<16x1xf32>
    %262 = vector.broadcast %261 : vector<16x1xf32> to vector<16x32xf32>
    %263 = arith.mulf %258, %262 : vector<16x32xf32>
    %264 = vector.broadcast %243 : vector<1x32xf32> to vector<16x32xf32>
    %265 = arith.mulf %263, %264 : vector<16x32xf32>
    %266 = vector.broadcast %245 : vector<1x32xf32> to vector<16x32xf32>
    %267 = arith.addf %265, %266 : vector<16x32xf32>
    %c0_116 = arith.constant 0 : index
    %c0_117 = arith.constant 0 : index
    %268 = vector.load %arg6[%c0_116, %c0_117] : memref<9x1xf32, #tpu.memory_space<vmem>>, vector<9x1xf32>
    %269 = vector.shape_cast %267 : vector<16x32xf32> to vector<2x8x32xf32>
    %270 = vector.extract_strided_slice %268 {offsets = [0, 0], sizes = [8, 1], strides = [1, 1]} : vector<9x1xf32> to vector<8x1xf32>
    %271 = vector.shape_cast %270 : vector<8x1xf32> to vector<1x8x1xf32>
    %272 = vector.broadcast %271 : vector<1x8x1xf32> to vector<2x8x32xf32>
    %273 = arith.mulf %269, %272 : vector<2x8x32xf32>
    %cst_118 = arith.constant dense<0.000000e+00> : vector<2x32xf32>
    %274 = vector.multi_reduction <add>, %273, %cst_118 [1] : vector<2x8x32xf32> to vector<2x32xf32>
    %275 = vector.extract_strided_slice %268 {offsets = [8, 0], sizes = [1, 1], strides = [1, 1]} : vector<9x1xf32> to vector<1x1xf32>
    %276 = vector.broadcast %275 : vector<1x1xf32> to vector<2x32xf32>
    %277 = arith.addf %274, %276 : vector<2x32xf32>
    %278 = vector.shape_cast %277 : vector<2x32xf32> to vector<2x1x32xf32>
    %c0_119 = arith.constant 0 : index
    %c0_120 = arith.constant 0 : index
    %c0_121 = arith.constant 0 : index
    %279 = vector.load %arg7[%c0_119, %c0_120, %c0_121] : memref<2x1x32xf32, #tpu.memory_space<vmem>>, vector<2x1x32xf32>
    tpu.vector_store %arg7[%c0_119, %c0_120, %c0_121], %278 {strides = array<i32>} : memref<2x1x32xf32, #tpu.memory_space<vmem>>, vector<2x1x32xf32>,
    return
  }
}

</mosaic_0001>

<bundles_post_ra>
// kernel: tpu_custom_call.1
= control target key start
LH: loop header
LB: loop body
LE: loop exit
PB: predicated region body
PF: predicated region fallthrough
CT: control target
= control target key end

     0   :  { %s6489_s0 = inlined_call_operand.vmem [shape: f32[2,8,32], index: 0, kind: input, shape index: {}]   ;;  %s6490_s1 = inlined_call_operand.vmem [shape: f32[6,32,32], index: 1, kind: input, shape index: {}]   ;;  %s6491_s2 = inlined_call_operand.vmem [shape: f32[2,32,32], index: 2, kind: input, shape index: {}]   ;;  %s6492_s3 = inlined_call_operand.vmem [shape: f32[2,33,512], index: 3, kind: input, shape index: {}]   ;;  %s6493_s4 = inlined_call_operand.vmem [shape: f32[2,512,32], index: 4, kind: input, shape index: {}]   ;;  %s6494_s5 = inlined_call_operand.vmem [shape: f32[18,1,32], index: 5, kind: input, shape index: {}]   ;;  %s6495_s6 = inlined_call_operand.vmem [shape: f32[9,1], index: 6, kind: input, shape index: {}]   ;;  %s6496_s7 = inlined_call_operand.hbm [shape: f32[2,1,32], index: 7, kind: output, shape index: {}]  }
   0x1   :  { %v4551_v0 = vld [vmem:[%s6490_s1 + $0x38] sm:$0xff]  ;;  %v4550_v2 = vld [vmem:[%s6490_s1 + $0x30] sm:$0xff]  ;;  %v4549_v4 = vld [vmem:[%s6490_s1 + $0x28] sm:$0xff] }
   0x2   :  { %v32_v1 = vld [vmem:[%s6490_s1 + $0x18] sm:$0xff]  ;;  %5043 = vmatprep.subr.mxu1 %v4551_v0  ;;  %v31_v3 = vld [vmem:[%s6490_s1 + $0x10] sm:$0xff]  ;;  %v30_v5 = vld [vmem:[%s6490_s1 + $0x8] sm:$0xff] }
   0x3   :  { %5032 = vmatprep.subr.mxu0 %v32_v1  ;;  %5044 = vmatpush3.msra.mxu1 %v4551_v0 }
   0x4   :  { %5033 = vmatpush3.msra.mxu0 %v32_v1  ;;  %5045 = vmatprep.subr.mxu1 %v4550_v2 }
   0x5   :  { %5034 = vmatprep.subr.mxu0 %v31_v3 }
   0x6   :  { %12 = vsyncpa [#allocation3], 0  ;;  %5046 = vmatpush3.msra.mxu1 %v4550_v2  ;;  %5035 = vmatpush3.msra.mxu0 %v31_v3  ;;  %v4548_v6 = vld [vmem:[%s6490_s1 + $0x20] sm:$0xff]  ;;  %vm40_vm0 = vcmask 261120   ;;  %v5480_v9 = vld [vmem:[%s6489_s0 + $0x8] sm:$0xff]  ;;  %v5397_v10 = vmov 0.0  }
   0x7   :  { %v5472_v7 = vld [vmem:[%s6489_s0] sm:$0xff]  ;;  %5047 = vmatprep.subr.mxu1 %v4549_v4  ;;  %5036 = vmatprep.subr.mxu0 %v30_v5  ;;  %vm5398_vm1 = vmmov 0   ;;  %v4559_v11 = vld [vmem:[%s6490_s1 + $0x58] sm:$0xff]  ;;  %v4558_v12 = vld [vmem:[%s6490_s1 + $0x50] sm:$0xff]  ;;  %vm346_vm2 = vcmask 64512   ;;  %s5399_s9 = smov 120  }
   0x8   :  { %v29_v8 = vld [vmem:[%s6490_s1] sm:$0xff]  ;;  %5048 = vmatpush3.msra.mxu1 %v4549_v4  ;;  %5037 = vmatpush3.msra.mxu0 %v30_v5  ;;  %v4557_v13 = vld [vmem:[%s6490_s1 + $0x48] sm:$0xff]  ;;  %s5400_s10 = smov 112   ;;  %s5401_s11 = smov 104   ;;  %vm1637_vm3 = vcmask 130048   ;;  %vm1640_vm4 = vcmask 195584  }
   0x9   :  { %5049 = vmatprep.subr.mxu1 %v4548_v6  ;;  %5051 = vmatprep.mubr.msk.f32.mxu1 %vm40_vm0, %v5472_v7  ;;  %v4556_v14 = vld [vmem:[%s6490_s1 + $0x40] sm:$0xff]  ;;  %s5402_s18 = smov 8   ;;  %s5403_s22 = smov 16   ;;  %vm4526_vm5 = vcmask 253952  }
   0xa   :  { %5050 = vmatpush3.msra.mxu1 %v4548_v6  ;;  %5038 = vmatprep.subr.mxu0 %v29_v8  ;;  %v4553_v15 = vld [vmem:[%s6494_s5 + $0x1] ss:$0 sm:$0xff]  ;;  %v4545_v17 = vld [vmem:[%s6494_s5] ss:$0 sm:$0xff]  ;;  %v4561_v37 = vld [vmem:[%s6494_s5 + $0x2] ss:$0 sm:$0xff] }
   0xb   :  { %5052 = vmatmul.mubr.msk.f32.vlgmr.msra.gmra.mxu1 %vm40_vm0, %v5480_v9  ;;  %5039 = vmatpush3.msra.mxu0 %v29_v8  ;;  %s5404_s23 = smov 24  }
   0xc   :  { %5040 = vmatprep.mubr.msk.f32.mxu0 %vm40_vm0, %v5472_v7  ;;  %5065 = vmatprep.subr.mxu1 %v5397_v10 }
   0xd   :  { %5041 = vmatmul.mubr.msk.f32.vlgmr.msra.gmra.mxu0 %vm40_vm0, %v5480_v9  ;;  %5067 = vmatprep.mubr.msk.f32.mxu1 %vm5398_vm1, %v5397_v10 }
   0xe   :  { %5062 = vmatprep.mubr.msk.f32.mxu0 %vm40_vm0, %v5472_v7  ;;  %5054 = vmatprep.subr.mxu0 %v4559_v11 }
   0xf   :  { %5055 = vmatpush3.msra.mxu0 %v4559_v11 }
  0x10   :  { %5056 = vmatprep.subr.mxu0 %v4558_v12 }
  0x11   :  { %5057 = vmatpush3.msra.mxu0 %v4558_v12 }
  0x12   :  { %5058 = vmatprep.subr.mxu0 %v4557_v13 }
  0x13   :  { %5059 = vmatpush3.msra.mxu0 %v4557_v13 }
  0x14   :  { %5060 = vmatprep.subr.mxu0 %v4556_v14 }
  0x15   :  { %5061 = vmatpush3.msra.mxu0 %v4556_v14 }
  0x16   :  { %5085 = vmatprep.subr.mxu0 %v5397_v10  ;;  %5063 = vmatmul.mubr.msk.f32.vlgmr.msra.gmra.mxu0 %vm40_vm0, %v5480_v9 }
  0x17   :  { %5087 = vmatprep.mubr.msk.f32.mxu0 %vm5398_vm1, %v5397_v10 }
  0xcb   :  { %v5053_v16 = vpop.f32.mrf.mxu1 }
  0xcc   :  { %v207_v18 = vadd.f32 %v5053_v16, %v4553_v15 }
  0xcd   :  { %v5042_v19 = vpop.f32.mrf.mxu0  ;;  %v201_v20 = vpop.f32.mrf.mxu1 }
  0xce   :  { %v119_v21 = vadd.f32 %v5042_v19, %v4545_v17  ;;  %v202_v22 = vadd.f32 %v4553_v15, %v201_v20  ;;  %316 = vrot.lane.b32.xlu1 %v207_v18, %s5399_s9 }
  0xcf   :  { %v113_v23 = vpop.f32.mrf.mxu0 }
  0xd0   :  { %v114_v24 = vadd.f32 %v4545_v17, %v113_v23  ;;  %314 = vrot.lane.b32.xlu0 %v202_v22, %s5399_s9  ;;  %5066 = vmatpush3.xpose.msk.msra.mxu1 %vm346_vm2, %v202_v22 }
  0xd1   :  { %5070 = vmatprep.subr.mxu1 %v5397_v10 }
  0xd2   :  { %302 = vrot.lane.b32.xlu1 %v119_v21, %s5399_s9 }
  0xd3   :  { %5068 = vmatmul.mubr.msk.f32.vlgmr.msra.gmra.mxu1 %vm346_vm2, %v114_v24 }
  0xd4   :  { %300 = vrot.lane.b32.xlu0 %v114_v24, %s5399_s9  ;;  %5071 = vmatpush3.xpose.msk.msra.mxu1 %vm346_vm2, %v207_v18 }
  0xd5   :  { %5072 = vmatprep.mubr.msk.f32.mxu1 %vm5398_vm1, %v5397_v10  ;;  %5075 = vmatprep.subr.mxu1 %v5397_v10 }
  0xd6   :  { %320 = vrot.lane.b32.xlu1 %v207_v18, %s5400_s10  ;;  %v5064_v38 = vpop.f32.mrf.mxu0 }
  0xd7   :  { %5073 = vmatmul.mubr.msk.f32.vlgmr.msra.gmra.mxu1 %vm346_vm2, %v119_v21  ;;  %v5573_v39 = vadd.f32 %v5064_v38, %v4561_v37 }
  0xd8   :  { %318 = vrot.lane.b32.xlu0 %v202_v22, %s5400_s10  ;;  %5077 = vmatprep.mubr.msk.f32.mxu1 %vm5398_vm1, %v5397_v10  ;;  %v289_v40 = vpop.f32.mrf.mxu0 }
  0xd9   :  { %v5575_v41 = vadd.f32 %v4561_v37, %v289_v40 }
  0xda   :  { %306 = vrot.lane.b32.xlu1 %v119_v21, %s5400_s10 }
  0xdc   :  { %304 = vrot.lane.b32.xlu0 %v114_v24, %s5400_s10 }
  0xde   :  { %324 = vrot.lane.b32.xlu1 %v207_v18, %s5401_s11 }
  0xe0   :  { %322 = vrot.lane.b32.xlu0 %v202_v22, %s5401_s11 }
  0xe2   :  { %310 = vrot.lane.b32.xlu1 %v119_v21, %s5401_s11 }
  0xe4   :  { %308 = vrot.lane.b32.xlu0 %v114_v24, %s5401_s11 }
 0x140   :  { %v317_v25 = vpop.permute.xlu1 %316 }
 0x142   :  { %v315_v26 = vpop.permute.xlu0 %314 }
 0x143   :  { %5076 = vmatpush3.xpose.msk.msra.mxu1 %vm346_vm2, %v315_v26 }
 0x144   :  { %v303_v27 = vpop.permute.xlu1 %302  ;;  %5080 = vmatprep.subr.mxu1 %v5397_v10 }
 0x146   :  { %v301_v28 = vpop.permute.xlu0 %300 }
 0x147   :  { %5078 = vmatmul.mubr.msk.f32.vlgmr.msra.gmra.mxu1 %vm346_vm2, %v301_v28 }
 0x148   :  { %5081 = vmatpush3.xpose.msk.msra.mxu1 %vm346_vm2, %v317_v25  ;;  %v321_v29 = vpop.permute.xlu1 %320  ;;  %5082 = vmatprep.mubr.msk.f32.mxu1 %vm5398_vm1, %v5397_v10 }
 0x149   :  { %5090 = vmatprep.subr.mxu1 %v5397_v10 }
 0x14a   :  { %v319_v30 = vpop.permute.xlu0 %318 }
 0x14b   :  { %5083 = vmatmul.mubr.msk.f32.vlgmr.msra.gmra.mxu1 %vm346_vm2, %v303_v27  ;;  %5086 = vmatpush3.xpose.msk.msra.mxu0 %vm346_vm2, %v319_v30 }
 0x14c   :  { %5091 = vmatpush3.xpose.msk.msra.mxu1 %vm346_vm2, %v321_v29  ;;  %v307_v31 = vpop.permute.xlu1 %306  ;;  %5092 = vmatprep.mubr.msk.f32.mxu1 %vm5398_vm1, %v5397_v10 }
 0x14d   :  { %5100 = vmatprep.subr.mxu1 %v5397_v10  ;;  %5095 = vmatprep.subr.mxu0 %v5397_v10 }
 0x14e   :  { %v305_v32 = vpop.permute.xlu0 %304 }
 0x14f   :  { %5088 = vmatmul.mubr.msk.f32.vlgmr.msra.gmra.mxu0 %vm346_vm2, %v305_v32  ;;  %5093 = vmatmul.mubr.msk.f32.vlgmr.msra.gmra.mxu1 %vm346_vm2, %v307_v31 }
 0x150   :  { %v325_v33 = vpop.permute.xlu1 %324  ;;  %5102 = vmatprep.mubr.msk.f32.mxu1 %vm5398_vm1, %v5397_v10  ;;  %5097 = vmatprep.mubr.msk.f32.mxu0 %vm5398_vm1, %v5397_v10 }
 0x151   :  { %5101 = vmatpush3.xpose.msk.msra.mxu1 %vm346_vm2, %v325_v33 }
 0x152   :  { %v323_v34 = vpop.permute.xlu0 %322  ;;  %5110 = vmatprep.subr.mxu1 %v5397_v10 }
 0x153   :  { %5096 = vmatpush3.xpose.msk.msra.mxu0 %vm346_vm2, %v323_v34 }
 0x154   :  { %v311_v35 = vpop.permute.xlu1 %310  ;;  %5105 = vmatprep.subr.mxu0 %v5397_v10 }
 0x155   :  { %5103 = vmatmul.mubr.msk.f32.vlgmr.msra.gmra.mxu1 %vm346_vm2, %v311_v35 }
 0x156   :  { %v309_v36 = vpop.permute.xlu0 %308  ;;  %5112 = vmatprep.mubr.msk.f32.mxu1 %vm5398_vm1, %v5397_v10  ;;  %5111 = vmatpush3.msra.mxu1 %v5573_v39 }
 0x157   :  { %5098 = vmatmul.mubr.msk.f32.vlgmr.msra.gmra.mxu0 %vm346_vm2, %v309_v36  ;;  %5120 = vmatprep.subr.mxu1 %v5397_v10 }
 0x158   :  { %5107 = vmatprep.mubr.msk.f32.mxu0 %vm5398_vm1, %v5397_v10  ;;  %5106 = vmatpush3.msra.mxu0 %v5575_v41 }
 0x159   :  { %5115 = vmatprep.subr.mxu0 %v5397_v10 }
 0x193   :  { %v417_v42 = vpop.f32.mrf.mxu1 }
 0x194   :  { %v939_v43 = vsel %vm346_vm2, %v417_v42, -inf }
 0x195   :  { %940 = vmax.xlane.f32.xlu0 %v939_v43  ;;  %v5069_v44 = vpop.f32.mrf.mxu1 }
 0x197   :  { %v491_v45 = vpop.f32.mrf.mxu1 }
 0x198   :  { %v942_v46 = vsel %vm346_vm2, %v491_v45, -inf }
 0x199   :  { %943 = vmax.xlane.f32.xlu1 %v942_v46  ;;  %v5074_v47 = vpop.f32.mrf.mxu1 }
 0x207   :  { %v565_v48 = vpop.f32.mrf.mxu1 }
 0x208   :  { %v945_v49 = vsel %vm346_vm2, %v565_v48, -inf }
 0x209   :  { %946 = vmax.xlane.f32.xlu0 %v945_v49  ;;  %v5079_v50 = vpop.f32.mrf.mxu1 }
 0x20b   :  { %v639_v51 = vpop.f32.mrf.mxu1 }
 0x20c   :  { %v948_v52 = vsel %vm346_vm2, %v639_v51, -inf }
 0x20d   :  { %949 = vmax.xlane.f32.xlu0 %v948_v52  ;;  %v5084_v53 = vpop.f32.mrf.mxu1 }
 0x20f   :  { %v713_v54 = vpop.f32.mrf.mxu0  ;;  %v787_v55 = vpop.f32.mrf.mxu1 }
 0x210   :  { %v951_v56 = vsel %vm346_vm2, %v713_v54, -inf  ;;  %v954_v57 = vsel %vm346_vm2, %v787_v55, -inf }
 0x211   :  { %v5089_v58 = vpop.f32.mrf.mxu0  ;;  %952 = vmax.xlane.f32.xlu1 %v951_v56  ;;  %955 = vmax.xlane.f32.xlu0 %v954_v57  ;;  %v5094_v59 = vpop.f32.mrf.mxu1 }
 0x215   :  { %v935_v60 = vpop.f32.mrf.mxu1 }
 0x216   :  { %v960_v61 = vsel %vm346_vm2, %v935_v60, -inf }
 0x217   :  { %v861_v62 = vpop.f32.mrf.mxu0  ;;  %961 = vmax.xlane.f32.xlu0 %v960_v61  ;;  %v5104_v63 = vpop.f32.mrf.mxu1 }
 0x218   :  { %v957_v0 = vsel %vm346_vm2, %v861_v62, -inf }
 0x219   :  { %v5099_v1 = vpop.f32.mrf.mxu0  ;;  %958 = vmax.xlane.f32.xlu1 %v957_v0 }
 0x21e   :  { %v941_v5 = vpop.xlane.xlu0 %940 }
 0x21f   :  { %v963_v6 = vsub.f32 %v417_v42, %v941_v5 }
 0x221   :  { %v971_v8 = vmul.f32 1.442695, %v963_v6 }
 0x222   :  { %v944_v2 = vpop.xlane.xlu1 %943 }
 0x223   :  { %v964_v3 = vsub.f32 %v491_v45, %v944_v2 }
 0x225   :  { %v973_v4 = vmul.f32 1.442695, %v964_v3 }
 0x227   :  { %5295 = vpow2.f32 %v973_v4 }
 0x228   :  { %5297 = vpow2.f32 %v971_v8 }
 0x22a   :  { %328 = vrot.lane.b32.xlu1 %v5575_v41, %s5399_s9 }
 0x22d   :  { %330 = vrot.lane.b32.xlu0 %v5573_v39, %s5399_s9 }
 0x22e   :  { %334 = vrot.lane.b32.xlu1 %v5575_v41, %s5400_s10 }
 0x232   :  { %336 = vrot.lane.b32.xlu1 %v5573_v39, %s5400_s10 }
 0x234   :  { %v5296_v11 = vpop.eup %5295 }
 0x235   :  { %v990_v12 = vsel %vm346_vm2, %v5296_v11, 0.0  ;;  %v5298_v13 = vpop.eup %5297 }
 0x236   :  { %v987_v14 = vsel %vm346_vm2, %v5298_v13, 0.0 }
 0x24c   :  { %991 = vadd.xlane.f32.xlu0 %v990_v12 }
 0x256   :  { %988 = vadd.xlane.f32.xlu1 %v987_v14 }
 0x292   :  { %v947_v15 = vpop.xlane.xlu0 %946 }
 0x293   :  { %v965_v16 = vsub.f32 %v565_v48, %v947_v15 }
 0x295   :  { %v975_v17 = vmul.f32 1.442695, %v965_v16 }
 0x296   :  { %v950_v18 = vpop.xlane.xlu0 %949 }
 0x297   :  { %5299 = vpow2.f32 %v975_v17  ;;  %v966_v19 = vsub.f32 %v639_v51, %v950_v18  ;;  %v1646_v18 = vld [vmem:[%s6491_s2 + $0x18] sm:$0xff] }
 0x299   :  { %v977_v20 = vmul.f32 1.442695, %v966_v19  ;;  %v1645_v19 = vld [vmem:[%s6491_s2 + $0x10] sm:$0xff] }
 0x29a   :  { %v953_v21 = vpop.xlane.xlu1 %952  ;;  %v956_v22 = vpop.xlane.xlu0 %955 }
 0x29b   :  { %5301 = vpow2.f32 %v977_v20  ;;  %v967_v23 = vsub.f32 %v713_v54, %v953_v21  ;;  %v968_v24 = vsub.f32 %v787_v55, %v956_v22  ;;  %v1644_v22 = vld [vmem:[%s6491_s2 + $0x8] sm:$0xff] }
 0x29d   :  { %v979_v25 = vmul.f32 1.442695, %v967_v23  ;;  %v981_v26 = vmul.f32 1.442695, %v968_v24  ;;  %v1643_v24 = vld [vmem:[%s6491_s2] sm:$0xff] }
 0x29f   :  { %5303 = vpow2.f32 %v979_v25 }
 0x2a0   :  { %5305 = vpow2.f32 %v981_v26  ;;  %v962_v27 = vpop.xlane.xlu0 %961 }
 0x2a1   :  { %v970_v28 = vsub.f32 %v935_v60, %v962_v27 }
 0x2a2   :  { %v959_v29 = vpop.xlane.xlu1 %958 }
 0x2a3   :  { %v985_v30 = vmul.f32 1.442695, %v970_v28  ;;  %v969_v31 = vsub.f32 %v861_v62, %v959_v29 }
 0x2a4   :  { %v5300_v32 = vpop.eup %5299  ;;  %v331_v48 = vpop.permute.xlu0 %330 }
 0x2a5   :  { %5307 = vpow2.f32 %v985_v30  ;;  %v983_v33 = vmul.f32 1.442695, %v969_v31  ;;  %v993_v34 = vsel %vm346_vm2, %v5300_v32, 0.0 }
 0x2a6   :  { %994 = vadd.xlane.f32.xlu1 %v993_v34  ;;  %v329_v47 = vpop.permute.xlu1 %328 }
 0x2a7   :  { %5309 = vpow2.f32 %v983_v33 }
 0x2a8   :  { %v5302_v35 = vpop.eup %5301 }
 0x2a9   :  { %v996_v36 = vsel %vm346_vm2, %v5302_v35, 0.0 }
 0x2aa   :  { %997 = vadd.xlane.f32.xlu0 %v996_v36  ;;  %v335_v49 = vpop.permute.xlu1 %334 }
 0x2ac   :  { %v5304_v37 = vpop.eup %5303 }
 0x2ad   :  { %v5306_v38 = vpop.eup %5305  ;;  %v999_v40 = vsel %vm346_vm2, %v5304_v37, 0.0 }
 0x2ae   :  { %1000 = vadd.xlane.f32.xlu1 %v999_v40  ;;  %v1002_v42 = vsel %vm346_vm2, %v5306_v38, 0.0  ;;  %v337_v51 = vpop.permute.xlu1 %336 }
 0x2af   :  { %1003 = vadd.xlane.f32.xlu0 %v1002_v42 }
 0x2b2   :  { %v5603_v43 = vpop.eup %5307 }
 0x2b3   :  { %v1008_v44 = vsel %vm346_vm2, %v5603_v43, 0.0 }
 0x2b4   :  { %v5607_v45 = vpop.eup %5309  ;;  %1009 = vadd.xlane.f32.xlu0 %v1008_v44 }
 0x2b5   :  { %v1005_v46 = vsel %vm346_vm2, %v5607_v45, 0.0 }
 0x2b6   :  { %1006 = vadd.xlane.f32.xlu1 %v1005_v46 }
 0x2c7   :  { %342 = vrot.lane.b32.xlu1 %v5573_v39, %s5401_s11 }
 0x2ca   :  { %340 = vrot.lane.b32.xlu0 %v5575_v41, %s5401_s11 }
 0x2d5   :  { %v992_v50 = vpop.xlane.xlu0 %991 }
 0x2d6   :  { %5311 = vrcp.f32 %v992_v50 }
 0x2df   :  { %v989_v52 = vpop.xlane.xlu1 %988 }
 0x2e0   :  { %5313 = vrcp.f32 %v989_v52 }
 0x2e3   :  { %v5312_v53 = vpop.eup %5311 }
 0x2e4   :  { %v1014_v54 = vmul.f32 %v5312_v53, %v5296_v11 }
 0x2e6   :  { %5113 = vmatmul.mubr.msk.f32.vlgmr.msra.gmra.mxu1 %vm346_vm2, %v1014_v54 }
 0x2e7   :  { %5121 = vmatpush3.msra.mxu1 %v331_v48  ;;  %5122 = vmatprep.mubr.msk.f32.mxu1 %vm5398_vm1, %v5397_v10 }
 0x2e8   :  { %5130 = vmatprep.subr.mxu1 %v5397_v10 }
 0x2ed   :  { %v5314_v39 = vpop.eup %5313 }
 0x2ee   :  { %v1012_v41 = vmul.f32 %v5314_v39, %v5298_v13 }
 0x2f0   :  { %5108 = vmatmul.mubr.msk.f32.vlgmr.msra.gmra.mxu0 %vm346_vm2, %v1012_v41 }
 0x2f1   :  { %5116 = vmatpush3.msra.mxu0 %v329_v47  ;;  %5117 = vmatprep.mubr.msk.f32.mxu0 %vm5398_vm1, %v5397_v10 }
 0x2f2   :  { %5125 = vmatprep.subr.mxu0 %v5397_v10 }
 0x32f   :  { %v995_v55 = vpop.xlane.xlu1 %994 }
 0x330   :  { %5315 = vrcp.f32 %v995_v55 }
 0x333   :  { %v998_v56 = vpop.xlane.xlu0 %997 }
 0x334   :  { %5317 = vrcp.f32 %v998_v56 }
 0x337   :  { %v1001_v57 = vpop.xlane.xlu1 %1000 }
 0x338   :  { %5319 = vrcp.f32 %v1001_v57  ;;  %v1004_v58 = vpop.xlane.xlu0 %1003 }
 0x339   :  { %5321 = vrcp.f32 %v1004_v58 }
 0x33d   :  { %v5316_v59 = vpop.eup %5315  ;;  %v1010_v60 = vpop.xlane.xlu0 %1009 }
 0x33e   :  { %5323 = vrcp.f32 %v1010_v60  ;;  %v1016_v61 = vmul.f32 %v5316_v59, %v5300_v32 }
 0x33f   :  { %v1007_v62 = vpop.xlane.xlu1 %1006 }
 0x340   :  { %5325 = vrcp.f32 %v1007_v62  ;;  %5118 = vmatmul.mubr.msk.f32.vlgmr.msra.gmra.mxu0 %vm346_vm2, %v1016_v61 }
 0x341   :  { %v5318_v63 = vpop.eup %5317  ;;  %5126 = vmatpush3.msra.mxu0 %v335_v49  ;;  %5127 = vmatprep.mubr.msk.f32.mxu0 %vm5398_vm1, %v5397_v10  ;;  %v341_v5 = vpop.permute.xlu0 %340  ;;  %v4591_v49 = vld [vmem:[%s6494_s5 + $0x3] ss:$0 sm:$0xff] }
 0x342   :  { %v1018_v0 = vmul.f32 %v5318_v63, %v5302_v35  ;;  %5135 = vmatprep.subr.mxu0 %v5397_v10  ;;  %v1800_v63 = vld [vmem:[%s6492_s3 + $0x68] sm:$0xff] }
 0x343   :  { %v343_v6 = vpop.permute.xlu1 %342 }
 0x344   :  { %5123 = vmatmul.mubr.msk.f32.vlgmr.msra.gmra.mxu1 %vm346_vm2, %v1018_v0  ;;  %v1802_v0 = vld [vmem:[%s6492_s3 + $0x78] sm:$0xff] }
 0x345   :  { %v5320_v1 = vpop.eup %5319  ;;  %5131 = vmatpush3.msra.mxu1 %v337_v51  ;;  %5132 = vmatprep.mubr.msk.f32.mxu1 %vm5398_vm1, %v5397_v10 }
 0x346   :  { %v5322_v2 = vpop.eup %5321  ;;  %5140 = vmatprep.subr.mxu1 %v5397_v10  ;;  %v1020_v3 = vmul.f32 %v5320_v1, %v5304_v37  ;;  %v1799_v1 = vld [vmem:[%s6492_s3 + $0x60] sm:$0xff] }
 0x347   :  { %v1022_v4 = vmul.f32 %v5322_v2, %v5306_v38  ;;  %v1801_v2 = vld [vmem:[%s6492_s3 + $0x70] sm:$0xff] }
 0x348   :  { %5128 = vmatmul.mubr.msk.f32.vlgmr.msra.gmra.mxu0 %vm346_vm2, %v1020_v3  ;;  %v1796_v3 = vld [vmem:[%s6492_s3 + $0x48] sm:$0xff] }
 0x349   :  { %5133 = vmatmul.mubr.msk.f32.vlgmr.msra.gmra.mxu1 %vm346_vm2, %v1022_v4  ;;  %5136 = vmatpush3.msra.mxu0 %v341_v5  ;;  %v1798_v4 = vld [vmem:[%s6492_s3 + $0x58] sm:$0xff]  ;;  %v1795_v5 = vld [vmem:[%s6492_s3 + $0x40] sm:$0xff] }
 0x34a   :  { %5141 = vmatpush3.msra.mxu1 %v343_v6  ;;  %5142 = vmatprep.mubr.msk.f32.mxu1 %vm5398_vm1, %v5397_v10  ;;  %v1797_v6 = vld [vmem:[%s6492_s3 + $0x50] sm:$0xff] }
 0x34b   :  { %v5324_v8 = vpop.eup %5323  ;;  %5137 = vmatprep.mubr.msk.f32.mxu0 %vm5398_vm1, %v5397_v10  ;;  %5145 = vmatprep.subr.mxu0 %v1646_v18 }
 0x34c   :  { %v1026_v11 = vmul.f32 %v5324_v8, %v5603_v43  ;;  %1853 = vmatprep.subr.mxu1 %v1800_v63  ;;  %v1792_v8 = vld [vmem:[%s6492_s3 + $0x28] sm:$0xff]  ;;  %v2031_v63 = vld [vmem:[%s6493_s4 + $0x140] sm:$0xff] }
 0x34d   :  { %v5326_v12 = vpop.eup %5325 }
 0x34e   :  { %5143 = vmatmul.mubr.msk.f32.vlgmr.msra.gmra.mxu1 %vm346_vm2, %v1026_v11  ;;  %v1024_v13 = vmul.f32 %v5326_v12, %v5607_v45  ;;  %v1794_v11 = vld [vmem:[%s6492_s3 + $0x38] sm:$0xff]  ;;  %v1791_v12 = vld [vmem:[%s6492_s3 + $0x20] sm:$0xff] }
 0x34f   :  { %1893 = vmatprep.mubr.f32.mxu1 %v5397_v10  ;;  %1854 = vmatpush1.msra.mxu1 %v1799_v1  ;;  %v2046_v1 = vld [vmem:[%s6493_s4 + $0x1b8] sm:$0xff] }
 0x350   :  { %5138 = vmatmul.mubr.msk.f32.vlgmr.msra.gmra.mxu0 %vm346_vm2, %v1024_v13  ;;  %1855 = vmatprep.subr.mxu1 %v1796_v3  ;;  %v1793_v13 = vld [vmem:[%s6492_s3 + $0x30] sm:$0xff]  ;;  %v2030_v3 = vld [vmem:[%s6493_s4 + $0x138] sm:$0xff] }
 0x351   :  { %5146 = vmatpush3.msra.mxu0 %v1646_v18  ;;  %1856 = vmatpush1.msra.mxu1 %v1795_v5  ;;  %v2022_v18 = vld [vmem:[%s6493_s4 + $0xf8] sm:$0xff]  ;;  %v2045_v5 = vld [vmem:[%s6493_s4 + $0x1b0] sm:$0xff] }
 0x352   :  { %5147 = vmatprep.subr.mxu0 %v1645_v19  ;;  %1857 = vmatprep.subr.mxu1 %v1792_v8  ;;  %v2029_v8 = vld [vmem:[%s6493_s4 + $0x130] sm:$0xff] }
 0x353   :  { %5148 = vmatpush3.msra.mxu0 %v1645_v19  ;;  %1858 = vmatpush1.msra.mxu1 %v1791_v12  ;;  %v2054_v19 = vld [vmem:[%s6493_s4 + $0x1f8] sm:$0xff]  ;;  %v2044_v12 = vld [vmem:[%s6493_s4 + $0x1a8] sm:$0xff] }
 0x354   :  { %5149 = vmatprep.subr.mxu0 %v1644_v22 }
 0x355   :  { %5150 = vmatpush3.msra.mxu0 %v1644_v22 }
 0x356   :  { %5151 = vmatprep.subr.mxu0 %v1643_v24 }
 0x357   :  { %5152 = vmatpush3.msra.mxu0 %v1643_v24 }
 0x358   :  { %1930 = vmatprep.subr.mxu0 %v1802_v0  ;;  %v2014_v0 = vld [vmem:[%s6493_s4 + $0xb8] sm:$0xff] }
 0x3a6   :  { %v1169_v14 = vpop.f32.mrf.mxu1 }
 0x3a8   :  { %v5114_v15 = vpop.f32.mrf.mxu1 }
 0x3a9   :  { %v1790_v15 = vld [vmem:[%s6492_s3 + $0x18] sm:$0xff] }
 0x3b0   :  { %v1096_v16 = vpop.f32.mrf.mxu0 }
 0x3b2   :  { %v5109_v17 = vpop.f32.mrf.mxu0 }
 0x3b3   :  { %v1789_v17 = vld [vmem:[%s6492_s3 + $0x10] sm:$0xff] }
 0x400   :  { %v1242_v20 = vpop.f32.mrf.mxu0 }
 0x401   :  { %1613 = vrot.lane.b32.xlu0 %v1242_v20, %s5402_s18 }
 0x402   :  { %v5119_v21 = vpop.f32.mrf.mxu0 }
 0x404   :  { %v1315_v23 = vpop.f32.mrf.mxu1 }
 0x405   :  { %1615 = vrot.lane.b32.xlu1 %v1315_v23, %s5402_s18 }
 0x406   :  { %v5124_v25 = vpop.f32.mrf.mxu1 }
 0x408   :  { %v1388_v26 = vpop.f32.mrf.mxu0 }
 0x409   :  { %v1461_v27 = vpop.f32.mrf.mxu1  ;;  %1621 = vrot.lane.b32.xlu0 %v1388_v26, %s5403_s22 }
 0x40a   :  { %1623 = vrot.lane.b32.xlu1 %v1461_v27, %s5403_s22  ;;  %v5129_v28 = vpop.f32.mrf.mxu0  ;;  %v4594_v27 = vld [vmem:[%s6494_s5 + $0x5] ss:$0 sm:$0xff] }
 0x40b   :  { %v5134_v29 = vpop.f32.mrf.mxu1 }
 0x40c   :  { %v4595_v29 = vld [vmem:[%s6494_s5 + $0x6] ss:$0 sm:$0xff] }
 0x40e   :  { %v1607_v30 = vpop.f32.mrf.mxu1 }
 0x40f   :  { %1631 = vrot.lane.b32.xlu1 %v1607_v30, %s5404_s23 }
 0x410   :  { %v1534_v31 = vpop.f32.mrf.mxu0  ;;  %v5144_v32 = vpop.f32.mrf.mxu1 }
 0x411   :  { %1629 = vrot.lane.b32.xlu0 %v1534_v31, %s5404_s23 }
 0x412   :  { %v5139_v33 = vpop.f32.mrf.mxu0 }
 0x473   :  { %v1614_v35 = vpop.permute.xlu0 %1613 }
 0x474   :  { %v1635_v38 = vsel %vm346_vm2, %v1096_v16, %v1614_v35  ;;  %v1787_v16 = vld [vmem:[%s6492_s3] sm:$0xff]  ;;  %v2038_v35 = vld [vmem:[%s6493_s4 + $0x178] sm:$0xff] }
 0x477   :  { %v1616_v34 = vpop.permute.xlu1 %1615 }
 0x478   :  { %v1636_v42 = vsel %vm346_vm2, %v1169_v14, %v1616_v34  ;;  %v1788_v14 = vld [vmem:[%s6492_s3 + $0x8] sm:$0xff]  ;;  %v2006_v34 = vld [vmem:[%s6493_s4 + $0x78] sm:$0xff] }
 0x479   :  { %1859 = vmatprep.subr.mxu1 %v1788_v14  ;;  %v2028_v14 = vld [vmem:[%s6493_s4 + $0x128] sm:$0xff] }
 0x47a   :  { %1860 = vmatpush1.msra.mxu1 %v1787_v16  ;;  %v2043_v16 = vld [vmem:[%s6493_s4 + $0x1a0] sm:$0xff] }
 0x47b   :  { %v1622_v37 = vpop.permute.xlu0 %1621  ;;  %4824 = vmatprep.subr.mxu1 %v2022_v18  ;;  %v2027_v18 = vld [vmem:[%s6493_s4 + $0x120] sm:$0xff] }
 0x47c   :  { %v1624_v36 = vpop.permute.xlu1 %1623  ;;  %v1638_v43 = vsel %vm1637_vm3, %v1635_v38, %v1622_v37  ;;  %v2021_v37 = vld [vmem:[%s6493_s4 + $0xf0] sm:$0xff] }
 0x47d   :  { %v1639_v45 = vsel %vm1637_vm3, %v1636_v42, %v1624_v36  ;;  %v2053_v38 = vld [vmem:[%s6493_s4 + $0x1f0] sm:$0xff] }
 0x47e   :  { %v2005_v42 = vld [vmem:[%s6493_s4 + $0x70] sm:$0xff] }
 0x481   :  { %v1632_v40 = vpop.permute.xlu1 %1631 }
 0x482   :  { %v1642_v47 = vsel %vm1640_vm4, %v1639_v45, %v1632_v40  ;;  %v2052_v45 = vld [vmem:[%s6493_s4 + $0x1e8] sm:$0xff] }
 0x483   :  { %v1630_v44 = vpop.permute.xlu0 %1629 }
 0x484   :  { %v1641_v46 = vsel %vm1640_vm4, %v1638_v43, %v1630_v44  ;;  %v2037_v43 = vld [vmem:[%s6493_s4 + $0x170] sm:$0xff]  ;;  %v2020_v44 = vld [vmem:[%s6493_s4 + $0xe8] sm:$0xff] }
 0x485   :  { %5153 = vmatprep.mubr.msk.f32.mxu0 %vm40_vm0, %v1641_v46  ;;  %v2004_v46 = vld [vmem:[%s6493_s4 + $0x68] sm:$0xff] }
 0x486   :  { %5154 = vmatmul.mubr.msk.f32.vlgmr.msra.gmra.mxu0 %vm40_vm0, %v1642_v47  ;;  %v2036_v47 = vld [vmem:[%s6493_s4 + $0x168] sm:$0xff] }
 0x487   :  { %1970 = vmatprep.mubr.f32.mxu0 %v5397_v10  ;;  %1931 = vmatpush1.msra.mxu0 %v1801_v2  ;;  %v1998_v2 = vld [vmem:[%s6493_s4 + $0x38] sm:$0xff] }
 0x488   :  { %1932 = vmatprep.subr.mxu0 %v1798_v4  ;;  %v2013_v4 = vld [vmem:[%s6493_s4 + $0xb0] sm:$0xff] }
 0x489   :  { %1933 = vmatpush1.msra.mxu0 %v1797_v6  ;;  %v1997_v6 = vld [vmem:[%s6493_s4 + $0x30] sm:$0xff] }
 0x48a   :  { %1934 = vmatprep.subr.mxu0 %v1794_v11  ;;  %v2012_v11 = vld [vmem:[%s6493_s4 + $0xa8] sm:$0xff] }
 0x48b   :  { %1935 = vmatpush1.msra.mxu0 %v1793_v13  ;;  %v1996_v13 = vld [vmem:[%s6493_s4 + $0x28] sm:$0xff] }
 0x48c   :  { %1936 = vmatprep.subr.mxu0 %v1790_v15  ;;  %v2011_v15 = vld [vmem:[%s6493_s4 + $0xa0] sm:$0xff] }
 0x48d   :  { %1937 = vmatpush1.msra.mxu0 %v1789_v17  ;;  %v1995_v17 = vld [vmem:[%s6493_s4 + $0x20] sm:$0xff] }
 0x48e   :  { %4862 = vmatprep.subr.mxu0 %v2054_v19  ;;  %v2010_v19 = vld [vmem:[%s6493_s4 + $0x98] sm:$0xff] }
 0x546   :  { %v5155_v48 = vpop.f32.mrf.mxu0 }
 0x547   :  { %v1729_v50 = vadd.f32 %v5155_v48, %v5480_v9  ;;  %v2019_v48 = vld [vmem:[%s6493_s4 + $0xe0] sm:$0xff] }
 0x548   :  { %v1719_v51 = vpop.f32.mrf.mxu0 }
 0x549   :  { %v1728_v52 = vadd.f32 %v1719_v51, %v5472_v7  ;;  %v1739_v53 = vadd.f32 %v4591_v49, %v1729_v50  ;;  %v2003_v50 = vld [vmem:[%s6493_s4 + $0x60] sm:$0xff] }
 0x54a   :  { %v2035_v51 = vld [vmem:[%s6493_s4 + $0x160] sm:$0xff] }
 0x54b   :  { %v1747_v54 = vsel %vm40_vm0, %v1739_v53, 0.0  ;;  %v1738_v39 = vadd.f32 %v4591_v49, %v1728_v52  ;;  %v2051_v49 = vld [vmem:[%s6493_s4 + $0x1e0] sm:$0xff]  ;;  %v2018_v52 = vld [vmem:[%s6493_s4 + $0xd8] sm:$0xff] }
 0x54c   :  { %1748 = vadd.xlane.f32.xlu1 %v1747_v54  ;;  %v2002_v54 = vld [vmem:[%s6493_s4 + $0x58] sm:$0xff] }
 0x54d   :  { %v1744_v41 = vsel %vm40_vm0, %v1738_v39, 0.0 }
 0x54e   :  { %1745 = vadd.xlane.f32.xlu0 %v1744_v41  ;;  %v2017_v41 = vld [vmem:[%s6493_s4 + $0xd0] sm:$0xff] }
 0x5d5   :  { %v1749_v55 = vpop.xlane.xlu1 %1748 }
 0x5d6   :  { %v1752_v56 = vmul.f32 0.03125, %v1749_v55  ;;  %v2049_v55 = vld [vmem:[%s6493_s4 + $0x1d0] sm:$0xff] }
 0x5d7   :  { %v1746_v57 = vpop.xlane.xlu0 %1745 }
 0x5d8   :  { %v1751_v58 = vmul.f32 0.03125, %v1746_v57  ;;  %v1754_v59 = vsub.f32 %v1739_v53, %v1752_v56  ;;  %v2050_v53 = vld [vmem:[%s6493_s4 + $0x1d8] sm:$0xff]  ;;  %v2001_v56 = vld [vmem:[%s6493_s4 + $0x50] sm:$0xff] }
 0x5d9   :  { %v2033_v57 = vld [vmem:[%s6493_s4 + $0x150] sm:$0xff] }
 0x5da   :  { %v1753_v60 = vsub.f32 %v1738_v39, %v1751_v58  ;;  %v1756_v62 = vmul.f32 %v1754_v59, %v1754_v59  ;;  %v2034_v39 = vld [vmem:[%s6493_s4 + $0x158] sm:$0xff]  ;;  %v2016_v58 = vld [vmem:[%s6493_s4 + $0xc8] sm:$0xff] }
 0x5dc   :  { %v1755_v61 = vmul.f32 %v1753_v60, %v1753_v60  ;;  %v1760_v7 = vsel %vm40_vm0, %v1756_v62, 0.0  ;;  %v2047_v62 = vld [vmem:[%s6493_s4 + $0x1c0] sm:$0xff] }
 0x5de   :  { %v1757_v9 = vsel %vm40_vm0, %v1755_v61, 0.0  ;;  %v2032_v61 = vld [vmem:[%s6493_s4 + $0x148] sm:$0xff] }
 0x5df   :  { %1758 = vadd.xlane.f32.xlu0 %v1757_v9  ;;  %v2015_v9 = vld [vmem:[%s6493_s4 + $0xc0] sm:$0xff] }
 0x5e3   :  { %1761 = vadd.xlane.f32.xlu0 %v1760_v7  ;;  %v1999_v7 = vld [vmem:[%s6493_s4 + $0x40] sm:$0xff] }
 0x668   :  { %v1759_v20 = vpop.xlane.xlu0 %1758 }
 0x669   :  { %v1763_v21 = vmul.f32 0.03125, %v1759_v20  ;;  %v2042_v20 = vld [vmem:[%s6493_s4 + $0x198] sm:$0xff] }
 0x66b   :  { %v1765_v22 = vadd.f32 1e-05, %v1763_v21  ;;  %v1994_v21 = vld [vmem:[%s6493_s4 + $0x18] sm:$0xff] }
 0x66c   :  { %v1762_v23 = vpop.xlane.xlu0 %1761 }
 0x66d   :  { %5327 = vrsqrt.f32 %v1765_v22  ;;  %v1764_v24 = vmul.f32 0.03125, %v1762_v23  ;;  %v2026_v22 = vld [vmem:[%s6493_s4 + $0x118] sm:$0xff]  ;;  %v2009_v23 = vld [vmem:[%s6493_s4 + $0x90] sm:$0xff] }
 0x66f   :  { %v1766_v25 = vadd.f32 1e-05, %v1764_v24  ;;  %v2041_v24 = vld [vmem:[%s6493_s4 + $0x190] sm:$0xff] }
 0x671   :  { %5329 = vrsqrt.f32 %v1766_v25  ;;  %v1993_v25 = vld [vmem:[%s6493_s4 + $0x10] sm:$0xff] }
 0x67a   :  { %v5328_v26 = vpop.eup %5327 }
 0x67b   :  { %v1769_v28 = vmul.f32 %v5328_v26, %v1753_v60  ;;  %v2000_v60 = vld [vmem:[%s6493_s4 + $0x48] sm:$0xff]  ;;  %v2025_v26 = vld [vmem:[%s6493_s4 + $0x110] sm:$0xff] }
 0x67d   :  { %v1777_v30 = vmul.f32 %v4594_v27, %v1769_v28  ;;  %v2040_v28 = vld [vmem:[%s6493_s4 + $0x188] sm:$0xff] }
 0x67e   :  { %v5330_v31 = vpop.eup %5329 }
 0x67f   :  { %v5738_v32 = vadd.f32 %v4595_v29, %v1777_v30  ;;  %v1770_v33 = vmul.f32 %v5330_v31, %v1754_v59  ;;  %v2048_v59 = vld [vmem:[%s6493_s4 + $0x1c8] sm:$0xff]  ;;  %v2007_v31 = vld [vmem:[%s6493_s4 + $0x80] sm:$0xff] }
 0x680   :  { %v2024_v30 = vld [vmem:[%s6493_s4 + $0x108] sm:$0xff] }
 0x681   :  { %4600 = vmatmul.mubr.msk.f32.vlgmr.msra.gmra.mxu1 %vm40_vm0, %v5738_v32  ;;  %4602 = vmatmul.mubr.msk.f32.vlgmr.msra.gmra.mxu0 %vm40_vm0, %v5738_v32  ;;  %v1778_v36 = vmul.f32 %v4594_v27, %v1770_v33  ;;  %v2008_v27 = vld [vmem:[%s6493_s4 + $0x88] sm:$0xff]  ;;  %v2039_v33 = vld [vmem:[%s6493_s4 + $0x180] sm:$0xff] }
 0x682   :  { %1899 = vmatprep.mubr.f32.mxu1 %v5397_v10  ;;  %1976 = vmatprep.mubr.f32.mxu0 %v5397_v10 }
 0x683   :  { %v5758_v40 = vadd.f32 %v4595_v29, %v1778_v36  ;;  %4825 = vmatpush3.msra.mxu1 %v2006_v34  ;;  %4863 = vmatpush3.msra.mxu0 %v2038_v35  ;;  %v1992_v29 = vld [vmem:[%s6493_s4 + $0x8] sm:$0xff]  ;;  %v1991_v34 = vld [vmem:[%s6493_s4] sm:$0xff] }
 0x684   :  { %4826 = vmatprep.subr.mxu1 %v2021_v37  ;;  %4864 = vmatprep.subr.mxu0 %v2053_v38  ;;  %v2023_v35 = vld [vmem:[%s6493_s4 + $0x100] sm:$0xff]  ;;  %v4598_v37 = vld [vmem:[%s6492_s3 + $0x90] ss:$0 sm:$0xff] }
 0x685   :  { %4601 = vmatmul.mubr.msk.f32.gmra.mxu1 %vm40_vm0, %v5758_v40  ;;  %4603 = vmatmul.mubr.msk.f32.gmra.mxu0 %vm40_vm0, %v5758_v40  ;;  %v4596_v36 = vld [vmem:[%s6492_s3 + $0x80] ss:$0 sm:$0xff] }
 0x686   :  { %4827 = vmatpush3.msra.mxu1 %v2005_v42  ;;  %4865 = vmatpush3.msra.mxu0 %v2037_v43  ;;  %v4597_v43 = vld [vmem:[%s6492_s3 + $0x88] ss:$0 sm:$0xff] }
 0x687   :  { %4828 = vmatprep.subr.mxu1 %v2020_v44  ;;  %4866 = vmatprep.subr.mxu0 %v2052_v45  ;;  %v4599_v44 = vld [vmem:[%s6492_s3 + $0x98] ss:$0 sm:$0xff] }
 0x688   :  { %4829 = vmatpush3.msra.mxu1 %v2004_v46  ;;  %4867 = vmatpush3.msra.mxu0 %v2036_v47 }
 0x689   :  { %4830 = vmatprep.subr.mxu1 %v2019_v48  ;;  %4868 = vmatprep.subr.mxu0 %v2051_v49 }
 0x68a   :  { %4831 = vmatpush3.msra.mxu1 %v2003_v50  ;;  %4869 = vmatpush3.msra.mxu0 %v2035_v51 }
 0x68b   :  { %4832 = vmatprep.subr.mxu1 %v2018_v52  ;;  %4870 = vmatprep.subr.mxu0 %v2050_v53 }
 0x68c   :  { %4833 = vmatpush3.msra.mxu1 %v2002_v54  ;;  %4871 = vmatpush3.msra.mxu0 %v2034_v39 }
 0x68d   :  { %4834 = vmatprep.subr.mxu1 %v2017_v41  ;;  %4872 = vmatprep.subr.mxu0 %v2049_v55 }
 0x68e   :  { %4835 = vmatpush3.msra.mxu1 %v2001_v56  ;;  %4873 = vmatpush3.msra.mxu0 %v2033_v57 }
 0x68f   :  { %4836 = vmatprep.subr.mxu1 %v2016_v58  ;;  %4874 = vmatprep.subr.mxu0 %v2048_v59 }
 0x690   :  { %4837 = vmatpush3.msra.mxu1 %v2000_v60  ;;  %4875 = vmatpush3.msra.mxu0 %v2032_v61 }
 0x691   :  { %4838 = vmatprep.subr.mxu1 %v2015_v9  ;;  %4876 = vmatprep.subr.mxu0 %v2047_v62 }
 0x692   :  { %4839 = vmatpush3.msra.mxu1 %v1999_v7  ;;  %4877 = vmatpush3.msra.mxu0 %v2031_v63 }
 0x693   :  { %4840 = vmatprep.subr.mxu1 %v2014_v0  ;;  %4878 = vmatprep.subr.mxu0 %v2046_v1 }
 0x694   :  { %4841 = vmatpush3.msra.mxu1 %v1998_v2  ;;  %4879 = vmatpush3.msra.mxu0 %v2030_v3 }
 0x695   :  { %4842 = vmatprep.subr.mxu1 %v2013_v4  ;;  %4880 = vmatprep.subr.mxu0 %v2045_v5 }
 0x696   :  { %4843 = vmatpush3.msra.mxu1 %v1997_v6  ;;  %4881 = vmatpush3.msra.mxu0 %v2029_v8 }
 0x697   :  { %4844 = vmatprep.subr.mxu1 %v2012_v11  ;;  %4882 = vmatprep.subr.mxu0 %v2044_v12 }
 0x698   :  { %4845 = vmatpush3.msra.mxu1 %v1996_v13  ;;  %4883 = vmatpush3.msra.mxu0 %v2028_v14  ;;  %v4605_v13 = vld [vmem:[%s6494_s5 + $0x4] ss:$0 sm:$0xff] }
 0x699   :  { %4846 = vmatprep.subr.mxu1 %v2011_v15  ;;  %4884 = vmatprep.subr.mxu0 %v2043_v16 }
 0x69a   :  { %4847 = vmatpush3.msra.mxu1 %v1995_v17  ;;  %4885 = vmatpush3.msra.mxu0 %v2027_v18 }
 0x69b   :  { %4848 = vmatprep.subr.mxu1 %v2010_v19  ;;  %4886 = vmatprep.subr.mxu0 %v2042_v20 }
 0x69c   :  { %4849 = vmatpush3.msra.mxu1 %v1994_v21  ;;  %4887 = vmatpush3.msra.mxu0 %v2026_v22 }
 0x69d   :  { %4850 = vmatprep.subr.mxu1 %v2009_v23  ;;  %4888 = vmatprep.subr.mxu0 %v2041_v24 }
 0x69e   :  { %4851 = vmatpush3.msra.mxu1 %v1993_v25  ;;  %4889 = vmatpush3.msra.mxu0 %v2025_v26 }
 0x69f   :  { %4852 = vmatprep.subr.mxu1 %v2008_v27  ;;  %4890 = vmatprep.subr.mxu0 %v2040_v28 }
 0x6a0   :  { %4853 = vmatpush3.msra.mxu1 %v1992_v29  ;;  %4891 = vmatpush3.msra.mxu0 %v2024_v30 }
 0x6a1   :  { %4854 = vmatprep.subr.mxu1 %v2007_v31  ;;  %4892 = vmatprep.subr.mxu0 %v2039_v33  ;;  %v4621_v33 = vld [vmem:[%s6490_s1 + $0x98] sm:$0xff] }
 0x6a2   :  { %4855 = vmatpush3.msra.mxu1 %v1991_v34  ;;  %4893 = vmatpush3.msra.mxu0 %v2023_v35  ;;  %v4612_v34 = vld [vmem:[%s6490_s1 + $0x70] sm:$0xff] }
 0x6a3   :  { %5167 = vmatprep.subr.mxu0 %v4621_v33  ;;  %v4620_v35 = vld [vmem:[%s6490_s1 + $0x90] sm:$0xff] }
 0x741   :  { %v1895_v38 = vpop.f32.mrf.mxu1  ;;  %v1972_v42 = vpop.f32.mrf.mxu0 }
 0x742   :  { %v1896_v45 = vadd.f32 %v4596_v36, %v1895_v38  ;;  %v1973_v46 = vadd.f32 %v4598_v37, %v1972_v42  ;;  %v4610_v38 = vld [vmem:[%s6490_s1 + $0x60] sm:$0xff] }
 0x743   :  { %v1897_v47 = vpop.f32.mrf.mxu1  ;;  %v1974_v48 = vpop.f32.mrf.mxu0  ;;  %v4618_v42 = vld [vmem:[%s6490_s1 + $0x80] sm:$0xff] }
 0x744   :  { %v1898_v49 = vadd.f32 %v4597_v43, %v1897_v47  ;;  %v1975_v50 = vadd.f32 %v4599_v44, %v1974_v48  ;;  %v1983_v39 = vmax.f32 %v1896_v45, 0.0  ;;  %v1985_v41 = vmax.f32 %v1973_v46, 0.0 }
 0x745   :  { %v1901_v51 = vpop.f32.mrf.mxu1  ;;  %v1978_v52 = vpop.f32.mrf.mxu0 }
 0x746   :  { %v1984_v53 = vmax.f32 %v1898_v49, 0.0  ;;  %v1986_v54 = vmax.f32 %v1975_v50, 0.0  ;;  %v1902_v55 = vadd.f32 %v4596_v36, %v1901_v51  ;;  %v1979_v56 = vadd.f32 %v4598_v37, %v1978_v52  ;;  %v4611_v36 = vld [vmem:[%s6490_s1 + $0x68] sm:$0xff]  ;;  %v4608_v51 = vld [vmem:[%s6494_s5 + $0x7] ss:$0 sm:$0xff] }
 0x747   :  { %v1903_v57 = vpop.f32.mrf.mxu1  ;;  %v1980_v58 = vpop.f32.mrf.mxu0  ;;  %v4619_v37 = vld [vmem:[%s6490_s1 + $0x88] sm:$0xff] }
 0x748   :  { %v1904_v59 = vadd.f32 %v4597_v43, %v1903_v57  ;;  %v1981_v60 = vadd.f32 %v4599_v44, %v1980_v58  ;;  %2119 = vmatprep.mubr.f32.mxu1 %v1984_v53  ;;  %2194 = vmatprep.mubr.f32.mxu0 %v1986_v54  ;;  %v1987_v62 = vmax.f32 %v1902_v55, 0.0  ;;  %v1989_v7 = vmax.f32 %v1979_v56, 0.0  ;;  %v4629_v43 = vld [vmem:[%s6490_s1 + $0xb8] sm:$0xff]  ;;  %v4609_v53 = vld [vmem:[%s6494_s5 + $0x8] ss:$0 sm:$0xff]  ;;  %v4628_v58 = vld [vmem:[%s6490_s1 + $0xb0] sm:$0xff] }
 0x749   :  { %2120 = vmatmul.mubr.f32.vlgmr.msra.gmra.mxu1 %v1983_v39  ;;  %2195 = vmatmul.mubr.f32.vlgmr.msra.gmra.mxu0 %v1985_v41 }
 0x74a   :  { %v1988_v61 = vmax.f32 %v1904_v59, 0.0  ;;  %v1990_v9 = vmax.f32 %v1981_v60, 0.0  ;;  %5168 = vmatpush3.msra.mxu0 %v4621_v33  ;;  %v4627_v59 = vld [vmem:[%s6490_s1 + $0xa8] sm:$0xff]  ;;  %v4626_v60 = vld [vmem:[%s6490_s1 + $0xa0] sm:$0xff] }
 0x74b   :  { %5169 = vmatprep.subr.mxu0 %v4620_v35 }
 0x74c   :  { %2124 = vmatprep.mubr.f32.mxu1 %v1988_v61  ;;  %2199 = vmatprep.mubr.f32.mxu0 %v1990_v9  ;;  %v4615_v61 = vld [vmem:[%s6494_s5 + $0x9] ss:$0 sm:$0xff]  ;;  %v4623_v9 = vld [vmem:[%s6494_s5 + $0xa] ss:$0 sm:$0xff] }
 0x74d   :  { %2125 = vmatmul.mubr.f32.gmra.mxu1 %v1987_v62  ;;  %2200 = vmatmul.mubr.f32.gmra.mxu0 %v1989_v7 }
 0x74e   :  { %5170 = vmatpush3.msra.mxu0 %v4620_v35 }
 0x74f   :  { %5171 = vmatprep.subr.mxu0 %v4619_v37 }
 0x750   :  { %5172 = vmatpush3.msra.mxu0 %v4619_v37 }
 0x751   :  { %5173 = vmatprep.subr.mxu0 %v4618_v42 }
 0x752   :  { %5174 = vmatpush3.msra.mxu0 %v4618_v42 }
 0x753   :  { %5189 = vmatprep.subr.mxu0 %v5397_v10 }
 0x809   :  { %v4856_v63 = vpop.f32.mrf.mxu1  ;;  %v4894_v0 = vpop.f32.mrf.mxu0 }
 0x80b   :  { %v4857_v1 = vpop.f32.mrf.mxu1  ;;  %v4895_v2 = vpop.f32.mrf.mxu0 }
 0x80c   :  { %v4858_v3 = vadd.f32 %v4857_v1, %v4856_v63  ;;  %v4896_v4 = vadd.f32 %v4895_v2, %v4894_v0 }
 0x80d   :  { %v4859_v5 = vpop.f32.mrf.mxu1  ;;  %v4897_v6 = vpop.f32.mrf.mxu0 }
 0x80e   :  { %v2197_v8 = vadd.f32 %v4896_v4, %v4858_v3 }
 0x80f   :  { %v4860_v11 = vpop.f32.mrf.mxu1  ;;  %v4898_v12 = vpop.f32.mrf.mxu0 }
 0x810   :  { %v4861_v14 = vadd.f32 %v4860_v11, %v4859_v5  ;;  %v4899_v15 = vadd.f32 %v4898_v12, %v4897_v6  ;;  %v2205_v16 = vadd.f32 %v2197_v8, %v5738_v32 }
 0x812   :  { %v2202_v17 = vadd.f32 %v4899_v15, %v4861_v14  ;;  %v2215_v18 = vadd.f32 %v4605_v13, %v2205_v16 }
 0x814   :  { %v2221_v19 = vsel %vm40_vm0, %v2215_v18, 0.0  ;;  %v2206_v20 = vadd.f32 %v2202_v17, %v5758_v40  ;;  %v4613_v40 = vld [vmem:[%s6490_s1 + $0x78] sm:$0xff] }
 0x815   :  { %2222 = vadd.xlane.f32.xlu1 %v2221_v19  ;;  %5156 = vmatprep.subr.mxu1 %v4613_v40  ;;  %v4631_v19 = vld [vmem:[%s6494_s5 + $0xb] ss:$0 sm:$0xff] }
 0x816   :  { %v2216_v21 = vadd.f32 %v4605_v13, %v2206_v20  ;;  %5157 = vmatpush3.msra.mxu1 %v4613_v40 }
 0x817   :  { %5158 = vmatprep.subr.mxu1 %v4612_v34 }
 0x818   :  { %v2224_v22 = vsel %vm40_vm0, %v2216_v21, 0.0  ;;  %5159 = vmatpush3.msra.mxu1 %v4612_v34 }
 0x819   :  { %2225 = vadd.xlane.f32.xlu0 %v2224_v22  ;;  %5160 = vmatprep.subr.mxu1 %v4611_v36 }
 0x81a   :  { %5161 = vmatpush3.msra.mxu1 %v4611_v36 }
 0x81b   :  { %5162 = vmatprep.subr.mxu1 %v4610_v38 }
 0x81c   :  { %5163 = vmatpush3.msra.mxu1 %v4610_v38 }
 0x81d   :  { %5178 = vmatprep.subr.mxu1 %v4629_v43 }
 0x89e   :  { %v2223_v23 = vpop.xlane.xlu1 %2222 }
 0x89f   :  { %v2227_v24 = vmul.f32 0.03125, %v2223_v23 }
 0x8a1   :  { %v2229_v25 = vsub.f32 %v2215_v18, %v2227_v24 }
 0x8a2   :  { %v2226_v26 = vpop.xlane.xlu0 %2225 }
 0x8a3   :  { %v2228_v27 = vmul.f32 0.03125, %v2226_v26  ;;  %v2231_v28 = vmul.f32 %v2229_v25, %v2229_v25 }
 0x8a5   :  { %v2230_v29 = vsub.f32 %v2216_v21, %v2228_v27  ;;  %v2233_v32 = vsel %vm40_vm0, %v2231_v28, 0.0 }
 0x8a6   :  { %2234 = vadd.xlane.f32.xlu1 %v2233_v32 }
 0x8a7   :  { %v2232_v30 = vmul.f32 %v2230_v29, %v2230_v29 }
 0x8a9   :  { %v2236_v31 = vsel %vm40_vm0, %v2232_v30, 0.0 }
 0x8aa   :  { %2237 = vadd.xlane.f32.xlu0 %v2236_v31 }
 0x92f   :  { %v2235_v44 = vpop.xlane.xlu1 %2234 }
 0x930   :  { %v2239_v45 = vmul.f32 0.03125, %v2235_v44 }
 0x932   :  { %v2241_v46 = vadd.f32 1e-05, %v2239_v45 }
 0x933   :  { %v2238_v47 = vpop.xlane.xlu0 %2237 }
 0x934   :  { %5331 = vrsqrt.f32 %v2241_v46  ;;  %v2240_v48 = vmul.f32 0.03125, %v2238_v47 }
 0x936   :  { %v2242_v49 = vadd.f32 1e-05, %v2240_v48 }
 0x938   :  { %5333 = vrsqrt.f32 %v2242_v49 }
 0x941   :  { %v5332_v50 = vpop.eup %5331 }
 0x942   :  { %v2245_v52 = vmul.f32 %v5332_v50, %v2229_v25 }
 0x944   :  { %v2253_v54 = vmul.f32 %v4608_v51, %v2245_v52 }
 0x945   :  { %v5334_v39 = vpop.eup %5333 }
 0x946   :  { %v2246_v41 = vmul.f32 %v5334_v39, %v2230_v29  ;;  %v5993_v55 = vadd.f32 %v4609_v53, %v2253_v54 }
 0x948   :  { %v2254_v56 = vmul.f32 %v4608_v51, %v2246_v41  ;;  %5164 = vmatprep.mubr.msk.f32.mxu1 %vm40_vm0, %v5993_v55  ;;  %5175 = vmatprep.mubr.msk.f32.mxu0 %vm40_vm0, %v5993_v55 }
 0x94a   :  { %v5999_v57 = vadd.f32 %v4609_v53, %v2254_v56 }
 0x94c   :  { %5165 = vmatmul.mubr.msk.f32.vlgmr.msra.gmra.mxu1 %vm40_vm0, %v5999_v57  ;;  %5176 = vmatmul.mubr.msk.f32.vlgmr.msra.gmra.mxu0 %vm40_vm0, %v5999_v57 }
 0x94d   :  { %5179 = vmatpush3.msra.mxu1 %v4629_v43  ;;  %5186 = vmatprep.mubr.msk.f32.mxu1 %vm40_vm0, %v5993_v55 }
 0x94e   :  { %5180 = vmatprep.subr.mxu1 %v4628_v58  ;;  %5191 = vmatprep.mubr.msk.f32.mxu0 %vm5398_vm1, %v5397_v10 }
 0x94f   :  { %5181 = vmatpush3.msra.mxu1 %v4628_v58 }
 0x950   :  { %5182 = vmatprep.subr.mxu1 %v4627_v59 }
 0x951   :  { %5183 = vmatpush3.msra.mxu1 %v4627_v59 }
 0x952   :  { %5184 = vmatprep.subr.mxu1 %v4626_v60 }
 0x953   :  { %5185 = vmatpush3.msra.mxu1 %v4626_v60 }
 0x954   :  { %5187 = vmatmul.mubr.msk.f32.vlgmr.msra.gmra.mxu1 %vm40_vm0, %v5999_v57  ;;  %5194 = vmatprep.subr.mxu1 %v5397_v10 }
 0x955   :  { %5196 = vmatprep.mubr.msk.f32.mxu1 %vm5398_vm1, %v5397_v10 }
 0xa0c   :  { %v5166_v62 = vpop.f32.mrf.mxu1  ;;  %v5177_v7 = vpop.f32.mrf.mxu0 }
 0xa0d   :  { %v2354_v63 = vadd.f32 %v5166_v62, %v4615_v61  ;;  %v2442_v0 = vadd.f32 %v5177_v7, %v4623_v9 }
 0xa0e   :  { %v2436_v1 = vpop.f32.mrf.mxu0  ;;  %v2348_v2 = vpop.f32.mrf.mxu1 }
 0xa0f   :  { %v2437_v3 = vadd.f32 %v4623_v9, %v2436_v1  ;;  %2551 = vrot.lane.b32.xlu0 %v2442_v0, %s5399_s9  ;;  %5195 = vmatpush3.xpose.msk.msra.mxu1 %vm346_vm2, %v2442_v0  ;;  %v2349_v4 = vadd.f32 %v4615_v61, %v2348_v2 }
 0xa10   :  { %2537 = vrot.lane.b32.xlu1 %v2354_v63, %s5399_s9  ;;  %5204 = vmatprep.subr.mxu1 %v5397_v10 }
 0xa11   :  { %5190 = vmatpush3.xpose.msk.msra.mxu0 %vm346_vm2, %v2437_v3 }
 0xa12   :  { %5197 = vmatmul.mubr.msk.f32.vlgmr.msra.gmra.mxu1 %vm346_vm2, %v2354_v63  ;;  %5199 = vmatprep.subr.mxu0 %v5397_v10 }
 0xa13   :  { %2553 = vrot.lane.b32.xlu0 %v2437_v3, %s5400_s10  ;;  %5206 = vmatprep.mubr.msk.f32.mxu1 %vm5398_vm1, %v5397_v10 }
 0xa14   :  { %2555 = vrot.lane.b32.xlu1 %v2442_v0, %s5400_s10  ;;  %5192 = vmatmul.mubr.msk.f32.vlgmr.msra.gmra.mxu0 %vm346_vm2, %v2349_v4  ;;  %v5188_v15 = vpop.f32.mrf.mxu1 }
 0xa15   :  { %5201 = vmatprep.mubr.msk.f32.mxu0 %vm5398_vm1, %v5397_v10  ;;  %v6085_v23 = vadd.f32 %v5188_v15, %v4631_v19 }
 0xa16   :  { %v2524_v18 = vpop.f32.mrf.mxu1 }
 0xa17   :  { %2539 = vrot.lane.b32.xlu0 %v2349_v4, %s5400_s10  ;;  %v6076_v20 = vadd.f32 %v4631_v19, %v2524_v18 }
 0xa18   :  { %2549 = vrot.lane.b32.xlu1 %v2437_v3, %s5399_s9 }
 0xa1b   :  { %2557 = vrot.lane.b32.xlu0 %v2437_v3, %s5401_s11 }
 0xa1c   :  { %2535 = vrot.lane.b32.xlu1 %v2349_v4, %s5399_s9 }
 0xa1f   :  { %2543 = vrot.lane.b32.xlu0 %v2349_v4, %s5401_s11 }
 0xa20   :  { %2541 = vrot.lane.b32.xlu1 %v2354_v63, %s5400_s10 }
 0xa24   :  { %2559 = vrot.lane.b32.xlu1 %v2442_v0, %s5401_s11 }
 0xa28   :  { %2545 = vrot.lane.b32.xlu1 %v2354_v63, %s5401_s11 }
 0xa81   :  { %v2552_v5 = vpop.permute.xlu0 %2551 }
 0xa82   :  { %v2538_v6 = vpop.permute.xlu1 %2537  ;;  %5205 = vmatpush3.xpose.msk.msra.mxu1 %vm346_vm2, %v2552_v5 }
 0xa83   :  { %5214 = vmatprep.subr.mxu1 %v5397_v10 }
 0xa85   :  { %v2554_v8 = vpop.permute.xlu0 %2553  ;;  %5207 = vmatmul.mubr.msk.f32.vlgmr.msra.gmra.mxu1 %vm346_vm2, %v2538_v6 }
 0xa86   :  { %v2556_v11 = vpop.permute.xlu1 %2555  ;;  %5216 = vmatprep.mubr.msk.f32.mxu1 %vm5398_vm1, %v5397_v10 }
 0xa87   :  { %5215 = vmatpush3.xpose.msk.msra.mxu1 %vm346_vm2, %v2556_v11 }
 0xa88   :  { %5224 = vmatprep.subr.mxu1 %v5397_v10 }
 0xa89   :  { %v2540_v13 = vpop.permute.xlu0 %2539 }
 0xa8a   :  { %v2550_v12 = vpop.permute.xlu1 %2549 }
 0xa8b   :  { %5200 = vmatpush3.xpose.msk.msra.mxu0 %vm346_vm2, %v2550_v12 }
 0xa8c   :  { %5209 = vmatprep.subr.mxu0 %v5397_v10 }
 0xa8d   :  { %v2558_v16 = vpop.permute.xlu0 %2557 }
 0xa8e   :  { %v2536_v14 = vpop.permute.xlu1 %2535 }
 0xa8f   :  { %5202 = vmatmul.mubr.msk.f32.vlgmr.msra.gmra.mxu0 %vm346_vm2, %v2536_v14 }
 0xa90   :  { %5210 = vmatpush3.xpose.msk.msra.mxu0 %vm346_vm2, %v2554_v8  ;;  %5211 = vmatprep.mubr.msk.f32.mxu0 %vm5398_vm1, %v5397_v10 }
 0xa91   :  { %5219 = vmatprep.subr.mxu0 %v5397_v10  ;;  %v2544_v21 = vpop.permute.xlu0 %2543 }
 0xa92   :  { %v2542_v17 = vpop.permute.xlu1 %2541 }
 0xa93   :  { %5212 = vmatmul.mubr.msk.f32.vlgmr.msra.gmra.mxu0 %vm346_vm2, %v2540_v13  ;;  %5217 = vmatmul.mubr.msk.f32.vlgmr.msra.gmra.mxu1 %vm346_vm2, %v2542_v17 }
 0xa94   :  { %5220 = vmatpush3.xpose.msk.msra.mxu0 %vm346_vm2, %v2558_v16  ;;  %5221 = vmatprep.mubr.msk.f32.mxu0 %vm5398_vm1, %v5397_v10 }
 0xa95   :  { %5229 = vmatprep.subr.mxu0 %v5397_v10  ;;  %5226 = vmatprep.mubr.msk.f32.mxu1 %vm5398_vm1, %v5397_v10 }
 0xa96   :  { %v2560_v22 = vpop.permute.xlu1 %2559 }
 0xa97   :  { %5222 = vmatmul.mubr.msk.f32.vlgmr.msra.gmra.mxu0 %vm346_vm2, %v2544_v21  ;;  %5225 = vmatpush3.xpose.msk.msra.mxu1 %vm346_vm2, %v2560_v22 }
 0xa98   :  { %5230 = vmatpush3.msra.mxu0 %v6076_v20  ;;  %5234 = vmatprep.subr.mxu1 %v5397_v10 }
 0xa99   :  { %5231 = vmatprep.mubr.msk.f32.mxu0 %vm5398_vm1, %v5397_v10  ;;  %5239 = vmatprep.subr.mxu0 %v5397_v10 }
 0xa9a   :  { %v2546_v24 = vpop.permute.xlu1 %2545 }
 0xa9b   :  { %5227 = vmatmul.mubr.msk.f32.vlgmr.msra.gmra.mxu1 %vm346_vm2, %v2546_v24 }
 0xa9c   :  { %5235 = vmatpush3.msra.mxu1 %v6085_v23  ;;  %5236 = vmatprep.mubr.msk.f32.mxu1 %vm5398_vm1, %v5397_v10 }
 0xa9d   :  { %5244 = vmatprep.subr.mxu1 %v5397_v10 }
 0xad2   :  { %v2725_v25 = vpop.f32.mrf.mxu1 }
 0xad3   :  { %v3176_v26 = vsel %vm346_vm2, %v2725_v25, -inf }
 0xad4   :  { %v5198_v27 = vpop.f32.mrf.mxu1  ;;  %3177 = vmax.xlane.f32.xlu1 %v3176_v26  ;;  %v2651_v28 = vpop.f32.mrf.mxu0 }
 0xad5   :  { %v3173_v29 = vsel %vm346_vm2, %v2651_v28, -inf }
 0xad6   :  { %3174 = vmax.xlane.f32.xlu0 %v3173_v29  ;;  %v5193_v32 = vpop.f32.mrf.mxu0 }
 0xb45   :  { %v2873_v30 = vpop.f32.mrf.mxu1 }
 0xb46   :  { %v3182_v37 = vsel %vm346_vm2, %v2873_v30, -inf }
 0xb47   :  { %v5208_v31 = vpop.f32.mrf.mxu1 }
 0xb4f   :  { %v2799_v40 = vpop.f32.mrf.mxu0 }
 0xb50   :  { %v3179_v33 = vsel %vm346_vm2, %v2799_v40, -inf }
 0xb51   :  { %3180 = vmax.xlane.f32.xlu0 %v3179_v33  ;;  %v5203_v34 = vpop.f32.mrf.mxu0 }
 0xb53   :  { %v2947_v35 = vpop.f32.mrf.mxu0  ;;  %v3021_v36 = vpop.f32.mrf.mxu1 }
 0xb54   :  { %v3185_v38 = vsel %vm346_vm2, %v2947_v35, -inf  ;;  %v3188_v45 = vsel %vm346_vm2, %v3021_v36, -inf }
 0xb55   :  { %v5218_v42 = vpop.f32.mrf.mxu1  ;;  %3183 = vmax.xlane.f32.xlu0 %v3182_v37  ;;  %3186 = vmax.xlane.f32.xlu1 %v3185_v38  ;;  %v5213_v43 = vpop.f32.mrf.mxu0 }
 0xb57   :  { %v3095_v44 = vpop.f32.mrf.mxu0 }
 0xb58   :  { %v3191_v46 = vsel %vm346_vm2, %v3095_v44, -inf }
 0xb59   :  { %3189 = vmax.xlane.f32.xlu0 %v3188_v45  ;;  %3192 = vmax.xlane.f32.xlu1 %v3191_v46  ;;  %v5223_v47 = vpop.f32.mrf.mxu0 }
 0xb5b   :  { %v3169_v48 = vpop.f32.mrf.mxu1 }
 0xb5c   :  { %v3194_v49 = vsel %vm346_vm2, %v3169_v48, -inf }
 0xb5d   :  { %v5228_v50 = vpop.f32.mrf.mxu1  ;;  %3195 = vmax.xlane.f32.xlu0 %v3194_v49  ;;  %v3178_v51 = vpop.xlane.xlu1 %3177 }
 0xb5e   :  { %v3198_v52 = vsub.f32 %v2725_v25, %v3178_v51 }
 0xb5f   :  { %v3175_v53 = vpop.xlane.xlu0 %3174 }
 0xb60   :  { %v3207_v54 = vmul.f32 1.442695, %v3198_v52  ;;  %v3197_v39 = vsub.f32 %v2651_v28, %v3175_v53 }
 0xb62   :  { %5335 = vpow2.f32 %v3207_v54  ;;  %v3205_v41 = vmul.f32 1.442695, %v3197_v39 }
 0xb64   :  { %5337 = vpow2.f32 %v3205_v41 }
 0xb6a   :  { %2563 = vrot.lane.b32.xlu1 %v6076_v20, %s5399_s9 }
 0xb6e   :  { %2569 = vrot.lane.b32.xlu1 %v6076_v20, %s5400_s10 }
 0xb6f   :  { %v5336_v56 = vpop.eup %5335 }
 0xb70   :  { %v3224_v58 = vsel %vm346_vm2, %v5336_v56, 0.0 }
 0xb71   :  { %v5338_v59 = vpop.eup %5337 }
 0xb72   :  { %2571 = vrot.lane.b32.xlu1 %v6085_v23, %s5400_s10  ;;  %v3221_v60 = vsel %vm346_vm2, %v5338_v59, 0.0 }
 0xb73   :  { %2565 = vrot.lane.b32.xlu0 %v6085_v23, %s5399_s9 }
 0xb92   :  { %3225 = vadd.xlane.f32.xlu0 %v3224_v58 }
 0xb96   :  { %3222 = vadd.xlane.f32.xlu1 %v3221_v60 }
 0xbda   :  { %v3181_v61 = vpop.xlane.xlu0 %3180 }
 0xbdb   :  { %v3199_v9 = vsub.f32 %v2799_v40, %v3181_v61 }
 0xbdd   :  { %v3209_v62 = vmul.f32 1.442695, %v3199_v9 }
 0xbde   :  { %v3184_v7 = vpop.xlane.xlu0 %3183  ;;  %v3187_v63 = vpop.xlane.xlu1 %3186 }
 0xbdf   :  { %5339 = vpow2.f32 %v3209_v62  ;;  %v3200_v0 = vsub.f32 %v2873_v30, %v3184_v7  ;;  %v3201_v1 = vsub.f32 %v2947_v35, %v3187_v63  ;;  %v4661_v7 = vld [vmem:[%s6491_s2 + $0x38] sm:$0xff]  ;;  %v4660_v63 = vld [vmem:[%s6491_s2 + $0x30] sm:$0xff] }
 0xbe1   :  { %v3211_v2 = vmul.f32 1.442695, %v3200_v0  ;;  %v3213_v3 = vmul.f32 1.442695, %v3201_v1  ;;  %v4659_v0 = vld [vmem:[%s6491_s2 + $0x28] sm:$0xff]  ;;  %v4658_v1 = vld [vmem:[%s6491_s2 + $0x20] sm:$0xff] }
 0xbe2   :  { %v3190_v4 = vpop.xlane.xlu0 %3189  ;;  %v3193_v5 = vpop.xlane.xlu1 %3192 }
 0xbe3   :  { %5341 = vpow2.f32 %v3211_v2  ;;  %v3202_v6 = vsub.f32 %v3021_v36, %v3190_v4  ;;  %v3203_v8 = vsub.f32 %v3095_v44, %v3193_v5 }
 0xbe4   :  { %5343 = vpow2.f32 %v3213_v3 }
 0xbe5   :  { %v3215_v11 = vmul.f32 1.442695, %v3202_v6  ;;  %v3217_v12 = vmul.f32 1.442695, %v3203_v8 }
 0xbe6   :  { %v3196_v13 = vpop.xlane.xlu0 %3195  ;;  %v2564_v32 = vpop.permute.xlu1 %2563 }
 0xbe7   :  { %5345 = vpow2.f32 %v3215_v11  ;;  %v3204_v14 = vsub.f32 %v3169_v48, %v3196_v13 }
 0xbe8   :  { %5347 = vpow2.f32 %v3217_v12 }
 0xbe9   :  { %v3219_v15 = vmul.f32 1.442695, %v3204_v14 }
 0xbea   :  { %v2570_v30 = vpop.permute.xlu1 %2569  ;;  %v2566_v31 = vpop.permute.xlu0 %2565 }
 0xbeb   :  { %5349 = vpow2.f32 %v3219_v15 }
 0xbec   :  { %v5340_v16 = vpop.eup %5339 }
 0xbed   :  { %v3227_v17 = vsel %vm346_vm2, %v5340_v16, 0.0 }
 0xbee   :  { %3228 = vadd.xlane.f32.xlu1 %v3227_v17  ;;  %v2572_v40 = vpop.permute.xlu1 %2571 }
 0xbf0   :  { %v5342_v18 = vpop.eup %5341 }
 0xbf1   :  { %v5344_v19 = vpop.eup %5343  ;;  %v3230_v21 = vsel %vm346_vm2, %v5342_v18, 0.0 }
 0xbf2   :  { %3231 = vadd.xlane.f32.xlu0 %v3230_v21  ;;  %v3233_v22 = vsel %vm346_vm2, %v5344_v19, 0.0 }
 0xbf3   :  { %3234 = vadd.xlane.f32.xlu1 %v3233_v22 }
 0xbf4   :  { %v5346_v24 = vpop.eup %5345 }
 0xbf5   :  { %v6113_v25 = vpop.eup %5347  ;;  %v3236_v26 = vsel %vm346_vm2, %v5346_v24, 0.0 }
 0xbf6   :  { %3237 = vadd.xlane.f32.xlu0 %v3236_v26  ;;  %v3239_v27 = vsel %vm346_vm2, %v6113_v25, 0.0 }
 0xbf7   :  { %3240 = vadd.xlane.f32.xlu1 %v3239_v27 }
 0xbf8   :  { %v6118_v28 = vpop.eup %5349 }
 0xbf9   :  { %v3242_v29 = vsel %vm346_vm2, %v6118_v28, 0.0 }
 0xbfa   :  { %3243 = vadd.xlane.f32.xlu0 %v3242_v29 }
 0xc08   :  { %2577 = vrot.lane.b32.xlu1 %v6085_v23, %s5401_s11 }
 0xc10   :  { %2575 = vrot.lane.b32.xlu0 %v6076_v20, %s5401_s11 }
 0xc1b   :  { %v3226_v33 = vpop.xlane.xlu0 %3225 }
 0xc1c   :  { %5351 = vrcp.f32 %v3226_v33 }
 0xc1f   :  { %v3223_v34 = vpop.xlane.xlu1 %3222 }
 0xc20   :  { %5353 = vrcp.f32 %v3223_v34 }
 0xc29   :  { %v5352_v35 = vpop.eup %5351 }
 0xc2a   :  { %v3248_v36 = vmul.f32 %v5352_v35, %v5336_v56 }
 0xc2c   :  { %5237 = vmatmul.mubr.msk.f32.vlgmr.msra.gmra.mxu1 %vm346_vm2, %v3248_v36 }
 0xc2d   :  { %v5354_v37 = vpop.eup %5353  ;;  %5245 = vmatpush3.msra.mxu1 %v2566_v31  ;;  %5246 = vmatprep.mubr.msk.f32.mxu1 %vm5398_vm1, %v5397_v10  ;;  %v4665_v31 = vld [vmem:[%s6494_s5 + $0xc] ss:$0 sm:$0xff] }
 0xc2e   :  { %v3246_v23 = vmul.f32 %v5354_v37, %v5338_v59  ;;  %5254 = vmatprep.subr.mxu1 %v5397_v10 }
 0xc30   :  { %5232 = vmatmul.mubr.msk.f32.vlgmr.msra.gmra.mxu0 %vm346_vm2, %v3246_v23 }
 0xc31   :  { %5240 = vmatpush3.msra.mxu0 %v2564_v32  ;;  %5241 = vmatprep.mubr.msk.f32.mxu0 %vm5398_vm1, %v5397_v10 }
 0xc32   :  { %5249 = vmatprep.subr.mxu0 %v5397_v10 }
 0xc77   :  { %v3229_v20 = vpop.xlane.xlu1 %3228 }
 0xc78   :  { %5355 = vrcp.f32 %v3229_v20 }
 0xc7b   :  { %v3232_v38 = vpop.xlane.xlu0 %3231 }
 0xc7c   :  { %5357 = vrcp.f32 %v3232_v38  ;;  %v3235_v42 = vpop.xlane.xlu1 %3234 }
 0xc7d   :  { %5359 = vrcp.f32 %v3235_v42 }
 0xc7f   :  { %v3238_v43 = vpop.xlane.xlu0 %3237 }
 0xc80   :  { %5361 = vrcp.f32 %v3238_v43  ;;  %v3241_v44 = vpop.xlane.xlu1 %3240 }
 0xc81   :  { %5363 = vrcp.f32 %v3241_v44 }
 0xc83   :  { %v3244_v45 = vpop.xlane.xlu0 %3243 }
 0xc84   :  { %5365 = vrcp.f32 %v3244_v45  ;;  %v2578_v56 = vpop.permute.xlu1 %2577 }
 0xc85   :  { %v5356_v46 = vpop.eup %5355 }
 0xc86   :  { %v3250_v47 = vmul.f32 %v5356_v46, %v5340_v16 }
 0xc87   :  { %v2576_v53 = vpop.permute.xlu0 %2575 }
 0xc88   :  { %5242 = vmatmul.mubr.msk.f32.vlgmr.msra.gmra.mxu0 %vm346_vm2, %v3250_v47 }
 0xc89   :  { %v5358_v48 = vpop.eup %5357  ;;  %5250 = vmatpush3.msra.mxu0 %v2570_v30  ;;  %5251 = vmatprep.mubr.msk.f32.mxu0 %vm5398_vm1, %v5397_v10 }
 0xc8a   :  { %v5360_v49 = vpop.eup %5359  ;;  %5259 = vmatprep.subr.mxu0 %v5397_v10  ;;  %v3252_v50 = vmul.f32 %v5358_v48, %v5342_v18  ;;  %v4683_v48 = vld [vmem:[%s6492_s3 + $0x108] sm:$0xff] }
 0xc8b   :  { %v3254_v51 = vmul.f32 %v5360_v49, %v5344_v19  ;;  %v4685_v49 = vld [vmem:[%s6492_s3 + $0x118] sm:$0xff] }
 0xc8c   :  { %5247 = vmatmul.mubr.msk.f32.vlgmr.msra.gmra.mxu1 %vm346_vm2, %v3252_v50  ;;  %v4682_v50 = vld [vmem:[%s6492_s3 + $0x100] sm:$0xff] }
 0xc8d   :  { %v5362_v52 = vpop.eup %5361  ;;  %5252 = vmatmul.mubr.msk.f32.vlgmr.msra.gmra.mxu0 %vm346_vm2, %v3254_v51  ;;  %5255 = vmatpush3.msra.mxu1 %v2572_v40  ;;  %v4684_v51 = vld [vmem:[%s6492_s3 + $0x110] sm:$0xff] }
 0xc8e   :  { %v5364_v54 = vpop.eup %5363  ;;  %5260 = vmatpush3.msra.mxu0 %v2576_v53  ;;  %5256 = vmatprep.mubr.msk.f32.mxu1 %vm5398_vm1, %v5397_v10  ;;  %v3256_v39 = vmul.f32 %v5362_v52, %v5346_v24  ;;  %v4679_v52 = vld [vmem:[%s6492_s3 + $0xe8] sm:$0xff]  ;;  %v4681_v53 = vld [vmem:[%s6492_s3 + $0xf8] sm:$0xff] }
 0xc8f   :  { %5261 = vmatprep.mubr.msk.f32.mxu0 %vm5398_vm1, %v5397_v10  ;;  %5264 = vmatprep.subr.mxu1 %v5397_v10  ;;  %v3258_v41 = vmul.f32 %v5364_v54, %v6113_v25  ;;  %v4678_v54 = vld [vmem:[%s6492_s3 + $0xe0] sm:$0xff] }
 0xc90   :  { %5257 = vmatmul.mubr.msk.f32.vlgmr.msra.gmra.mxu1 %vm346_vm2, %v3256_v39  ;;  %5269 = vmatprep.subr.mxu0 %v4661_v7  ;;  %v4680_v39 = vld [vmem:[%s6492_s3 + $0xf0] sm:$0xff] }
 0xc91   :  { %v5366_v58 = vpop.eup %5365  ;;  %5262 = vmatmul.mubr.msk.f32.vlgmr.msra.gmra.mxu0 %vm346_vm2, %v3258_v41  ;;  %5265 = vmatpush3.msra.mxu1 %v2578_v56  ;;  %v4675_v41 = vld [vmem:[%s6492_s3 + $0xc8] sm:$0xff]  ;;  %v4677_v56 = vld [vmem:[%s6492_s3 + $0xd8] sm:$0xff] }
 0xc92   :  { %5266 = vmatprep.mubr.msk.f32.mxu1 %vm5398_vm1, %v5397_v10  ;;  %v3260_v59 = vmul.f32 %v5366_v58, %v6118_v28  ;;  %5270 = vmatpush3.msra.mxu0 %v4661_v7  ;;  %v4674_v58 = vld [vmem:[%s6492_s3 + $0xc0] sm:$0xff]  ;;  %v4729_v7 = vld [vmem:[%s6493_s4 + $0x2f8] sm:$0xff] }
 0xc93   :  { %5271 = vmatprep.subr.mxu0 %v4660_v63  ;;  %4086 = vmatprep.subr.mxu1 %v4683_v48  ;;  %v4721_v48 = vld [vmem:[%s6493_s4 + $0x2b8] sm:$0xff] }
 0xc94   :  { %5267 = vmatmul.mubr.msk.f32.vlgmr.msra.gmra.mxu1 %vm346_vm2, %v3260_v59  ;;  %5272 = vmatpush3.msra.mxu0 %v4660_v63  ;;  %v4676_v59 = vld [vmem:[%s6492_s3 + $0xd0] sm:$0xff]  ;;  %v4761_v63 = vld [vmem:[%s6493_s4 + $0x3f8] sm:$0xff] }
 0xc95   :  { %4126 = vmatprep.mubr.f32.mxu1 %v5397_v10  ;;  %5273 = vmatprep.subr.mxu0 %v4659_v0 }
 0xc96   :  { %5274 = vmatpush3.msra.mxu0 %v4659_v0  ;;  %4087 = vmatpush1.msra.mxu1 %v4682_v50  ;;  %v4705_v50 = vld [vmem:[%s6493_s4 + $0x238] sm:$0xff] }
 0xc97   :  { %5275 = vmatprep.subr.mxu0 %v4658_v1  ;;  %4088 = vmatprep.subr.mxu1 %v4679_v52  ;;  %v4720_v52 = vld [vmem:[%s6493_s4 + $0x2b0] sm:$0xff] }
 0xc98   :  { %5276 = vmatpush3.msra.mxu0 %v4658_v1  ;;  %4089 = vmatpush1.msra.mxu1 %v4678_v54  ;;  %v4704_v54 = vld [vmem:[%s6493_s4 + $0x230] sm:$0xff] }
 0xc99   :  { %4163 = vmatprep.subr.mxu0 %v4685_v49  ;;  %4090 = vmatprep.subr.mxu1 %v4675_v41  ;;  %v4753_v49 = vld [vmem:[%s6493_s4 + $0x3b8] sm:$0xff]  ;;  %v4719_v41 = vld [vmem:[%s6493_s4 + $0x2a8] sm:$0xff] }
 0xc9a   :  { %4091 = vmatpush1.msra.mxu1 %v4674_v58  ;;  %v4703_v58 = vld [vmem:[%s6493_s4 + $0x228] sm:$0xff] }
 0xcec   :  { %v3403_v60 = vpop.f32.mrf.mxu1 }
 0xcee   :  { %v5238_v61 = vpop.f32.mrf.mxu1 }
 0xcef   :  { %v4673_v61 = vld [vmem:[%s6492_s3 + $0xb8] sm:$0xff] }
 0xcf0   :  { %v3330_v9 = vpop.f32.mrf.mxu0 }
 0xcf2   :  { %v5233_v62 = vpop.f32.mrf.mxu0 }
 0xcf3   :  { %v4672_v62 = vld [vmem:[%s6492_s3 + $0xb0] sm:$0xff] }
 0xd48   :  { %v3476_v2 = vpop.f32.mrf.mxu0 }
 0xd49   :  { %3847 = vrot.lane.b32.xlu0 %v3476_v2, %s5402_s18 }
 0xd4a   :  { %v5243_v3 = vpop.f32.mrf.mxu0 }
 0xd4c   :  { %v3549_v4 = vpop.f32.mrf.mxu1 }
 0xd4d   :  { %v3622_v5 = vpop.f32.mrf.mxu0  ;;  %3849 = vrot.lane.b32.xlu1 %v3549_v4, %s5402_s18 }
 0xd4e   :  { %3855 = vrot.lane.b32.xlu0 %v3622_v5, %s5403_s22  ;;  %v5248_v6 = vpop.f32.mrf.mxu1 }
 0xd4f   :  { %v5253_v8 = vpop.f32.mrf.mxu0 }
 0xd50   :  { %v3695_v11 = vpop.f32.mrf.mxu1  ;;  %v4668_v8 = vld [vmem:[%s6494_s5 + $0xe] ss:$0 sm:$0xff] }
 0xd51   :  { %v3768_v12 = vpop.f32.mrf.mxu0  ;;  %3857 = vrot.lane.b32.xlu1 %v3695_v11, %s5403_s22 }
 0xd52   :  { %3863 = vrot.lane.b32.xlu0 %v3768_v12, %s5404_s23  ;;  %v5258_v13 = vpop.f32.mrf.mxu1  ;;  %v4669_v12 = vld [vmem:[%s6494_s5 + $0xf] ss:$0 sm:$0xff] }
 0xd53   :  { %v5263_v14 = vpop.f32.mrf.mxu0 }
 0xd54   :  { %v3841_v15 = vpop.f32.mrf.mxu1 }
 0xd55   :  { %3865 = vrot.lane.b32.xlu1 %v3841_v15, %s5404_s23 }
 0xd56   :  { %v5268_v16 = vpop.f32.mrf.mxu1 }
 0xdbb   :  { %v3848_v17 = vpop.permute.xlu0 %3847 }
 0xdbc   :  { %v3869_v21 = vsel %vm346_vm2, %v3330_v9, %v3848_v17  ;;  %v4670_v9 = vld [vmem:[%s6492_s3 + $0xa0] sm:$0xff]  ;;  %v4713_v17 = vld [vmem:[%s6493_s4 + $0x278] sm:$0xff] }
 0xdbf   :  { %v3850_v18 = vpop.permute.xlu1 %3849 }
 0xdc0   :  { %v3856_v19 = vpop.permute.xlu0 %3855  ;;  %v3870_v27 = vsel %vm346_vm2, %v3403_v60, %v3850_v18  ;;  %v4671_v60 = vld [vmem:[%s6492_s3 + $0xa8] sm:$0xff]  ;;  %v4745_v18 = vld [vmem:[%s6493_s4 + $0x378] sm:$0xff] }
 0xdc1   :  { %v3871_v24 = vsel %vm1637_vm3, %v3869_v21, %v3856_v19  ;;  %4092 = vmatprep.subr.mxu1 %v4671_v60  ;;  %v4728_v21 = vld [vmem:[%s6493_s4 + $0x2f0] sm:$0xff]  ;;  %v4718_v60 = vld [vmem:[%s6493_s4 + $0x2a0] sm:$0xff] }
 0xdc2   :  { %4093 = vmatpush1.msra.mxu1 %v4670_v9  ;;  %v4702_v9 = vld [vmem:[%s6493_s4 + $0x220] sm:$0xff] }
 0xdc3   :  { %v3858_v22 = vpop.permute.xlu1 %3857  ;;  %4956 = vmatprep.subr.mxu1 %v4729_v7  ;;  %v4717_v7 = vld [vmem:[%s6493_s4 + $0x298] sm:$0xff] }
 0xdc4   :  { %v3864_v25 = vpop.permute.xlu0 %3863  ;;  %v3872_v28 = vsel %vm1637_vm3, %v3870_v27, %v3858_v22  ;;  %v4760_v22 = vld [vmem:[%s6493_s4 + $0x3f0] sm:$0xff]  ;;  %v4727_v27 = vld [vmem:[%s6493_s4 + $0x2e8] sm:$0xff] }
 0xdc5   :  { %v3873_v26 = vsel %vm1640_vm4, %v3871_v24, %v3864_v25  ;;  %v4712_v25 = vld [vmem:[%s6493_s4 + $0x270] sm:$0xff] }
 0xdc6   :  { %5277 = vmatprep.mubr.msk.f32.mxu0 %vm40_vm0, %v3873_v26  ;;  %v4744_v26 = vld [vmem:[%s6493_s4 + $0x370] sm:$0xff] }
 0xdc7   :  { %v3866_v29 = vpop.permute.xlu1 %3865 }
 0xdc8   :  { %v3874_v32 = vsel %vm1640_vm4, %v3872_v28, %v3866_v29  ;;  %v4711_v28 = vld [vmem:[%s6493_s4 + $0x268] sm:$0xff] }
 0xdc9   :  { %5278 = vmatmul.mubr.msk.f32.vlgmr.msra.gmra.mxu0 %vm40_vm0, %v3874_v32  ;;  %v4743_v29 = vld [vmem:[%s6493_s4 + $0x368] sm:$0xff]  ;;  %v4726_v32 = vld [vmem:[%s6493_s4 + $0x2e0] sm:$0xff] }
 0xdca   :  { %4203 = vmatprep.mubr.f32.mxu0 %v5397_v10  ;;  %4164 = vmatpush1.msra.mxu0 %v4684_v51  ;;  %v4737_v51 = vld [vmem:[%s6493_s4 + $0x338] sm:$0xff] }
 0xdcb   :  { %4165 = vmatprep.subr.mxu0 %v4681_v53  ;;  %v4752_v53 = vld [vmem:[%s6493_s4 + $0x3b0] sm:$0xff] }
 0xdcc   :  { %4166 = vmatpush1.msra.mxu0 %v4680_v39  ;;  %v4736_v39 = vld [vmem:[%s6493_s4 + $0x330] sm:$0xff] }
 0xdcd   :  { %4167 = vmatprep.subr.mxu0 %v4677_v56  ;;  %v4751_v56 = vld [vmem:[%s6493_s4 + $0x3a8] sm:$0xff] }
 0xdce   :  { %4168 = vmatpush1.msra.mxu0 %v4676_v59  ;;  %v4735_v59 = vld [vmem:[%s6493_s4 + $0x328] sm:$0xff] }
 0xdcf   :  { %4169 = vmatprep.subr.mxu0 %v4673_v61  ;;  %v4750_v61 = vld [vmem:[%s6493_s4 + $0x3a0] sm:$0xff] }
 0xdd0   :  { %4170 = vmatpush1.msra.mxu0 %v4672_v62  ;;  %v4734_v62 = vld [vmem:[%s6493_s4 + $0x320] sm:$0xff] }
 0xdd1   :  { %4994 = vmatprep.subr.mxu0 %v4761_v63  ;;  %v4749_v63 = vld [vmem:[%s6493_s4 + $0x398] sm:$0xff] }
 0xe89   :  { %v5279_v30 = vpop.f32.mrf.mxu0 }
 0xe8a   :  { %v3962_v40 = vadd.f32 %v5279_v30, %v5999_v57  ;;  %v4758_v30 = vld [vmem:[%s6493_s4 + $0x3e0] sm:$0xff] }
 0xe8b   :  { %v3952_v33 = vpop.f32.mrf.mxu0 }
 0xe8c   :  { %v3961_v34 = vadd.f32 %v3952_v33, %v5993_v55  ;;  %v3972_v35 = vadd.f32 %v4665_v31, %v3962_v40  ;;  %v4742_v40 = vld [vmem:[%s6493_s4 + $0x360] sm:$0xff]  ;;  %v4725_v33 = vld [vmem:[%s6493_s4 + $0x2d8] sm:$0xff] }
 0xe8e   :  { %v3980_v36 = vsel %vm40_vm0, %v3972_v35, 0.0  ;;  %v3971_v37 = vadd.f32 %v4665_v31, %v3961_v34  ;;  %v4710_v31 = vld [vmem:[%s6493_s4 + $0x260] sm:$0xff]  ;;  %v4757_v34 = vld [vmem:[%s6493_s4 + $0x3d8] sm:$0xff] }
 0xe8f   :  { %3981 = vadd.xlane.f32.xlu1 %v3980_v36  ;;  %v4741_v36 = vld [vmem:[%s6493_s4 + $0x358] sm:$0xff] }
 0xe90   :  { %v3977_v23 = vsel %vm40_vm0, %v3971_v37, 0.0 }
 0xe91   :  { %3978 = vadd.xlane.f32.xlu0 %v3977_v23  ;;  %v4756_v23 = vld [vmem:[%s6493_s4 + $0x3d0] sm:$0xff] }
 0xf18   :  { %v3982_v20 = vpop.xlane.xlu1 %3981 }
 0xf19   :  { %v3984_v38 = vmul.f32 0.03125, %v3982_v20  ;;  %v4708_v20 = vld [vmem:[%s6493_s4 + $0x250] sm:$0xff] }
 0xf1a   :  { %v3979_v42 = vpop.xlane.xlu0 %3978 }
 0xf1b   :  { %v3983_v43 = vmul.f32 0.03125, %v3979_v42  ;;  %v3986_v44 = vsub.f32 %v3972_v35, %v3984_v38  ;;  %v4709_v35 = vld [vmem:[%s6493_s4 + $0x258] sm:$0xff]  ;;  %v4740_v38 = vld [vmem:[%s6493_s4 + $0x350] sm:$0xff]  ;;  %v4723_v42 = vld [vmem:[%s6493_s4 + $0x2c8] sm:$0xff] }
 0xf1d   :  { %v3985_v45 = vsub.f32 %v3971_v37, %v3983_v43  ;;  %v3988_v47 = vmul.f32 %v3986_v44, %v3986_v44  ;;  %v4724_v37 = vld [vmem:[%s6493_s4 + $0x2d0] sm:$0xff]  ;;  %v4755_v43 = vld [vmem:[%s6493_s4 + $0x3c8] sm:$0xff] }
 0xf1f   :  { %v3987_v46 = vmul.f32 %v3985_v45, %v3985_v45  ;;  %v3992_v55 = vsel %vm40_vm0, %v3988_v47, 0.0  ;;  %v4706_v47 = vld [vmem:[%s6493_s4 + $0x240] sm:$0xff] }
 0xf21   :  { %v3989_v57 = vsel %vm40_vm0, %v3987_v46, 0.0  ;;  %v4722_v46 = vld [vmem:[%s6493_s4 + $0x2c0] sm:$0xff] }
 0xf22   :  { %3990 = vadd.xlane.f32.xlu0 %v3989_v57  ;;  %v4754_v57 = vld [vmem:[%s6493_s4 + $0x3c0] sm:$0xff] }
 0xf26   :  { %3993 = vadd.xlane.f32.xlu0 %v3992_v55  ;;  %v4738_v55 = vld [vmem:[%s6493_s4 + $0x340] sm:$0xff] }
 0xfab   :  { %v3991_v0 = vpop.xlane.xlu0 %3990 }
 0xfac   :  { %v3995_v1 = vmul.f32 0.03125, %v3991_v0  ;;  %v4701_v0 = vld [vmem:[%s6493_s4 + $0x218] sm:$0xff] }
 0xfae   :  { %v3997_v2 = vadd.f32 1e-05, %v3995_v1  ;;  %v4733_v1 = vld [vmem:[%s6493_s4 + $0x318] sm:$0xff] }
 0xfaf   :  { %v3994_v3 = vpop.xlane.xlu0 %3993 }
 0xfb0   :  { %5367 = vrsqrt.f32 %v3997_v2  ;;  %v3996_v4 = vmul.f32 0.03125, %v3994_v3  ;;  %v4716_v2 = vld [vmem:[%s6493_s4 + $0x290] sm:$0xff] }
 0xfb1   :  { %v4748_v3 = vld [vmem:[%s6493_s4 + $0x390] sm:$0xff] }
 0xfb2   :  { %v3998_v5 = vadd.f32 1e-05, %v3996_v4  ;;  %v4700_v4 = vld [vmem:[%s6493_s4 + $0x210] sm:$0xff] }
 0xfb4   :  { %5369 = vrsqrt.f32 %v3998_v5  ;;  %v4732_v5 = vld [vmem:[%s6493_s4 + $0x310] sm:$0xff] }
 0xfbd   :  { %v5368_v6 = vpop.eup %5367 }
 0xfbe   :  { %v4001_v11 = vmul.f32 %v5368_v6, %v3985_v45  ;;  %v4739_v45 = vld [vmem:[%s6493_s4 + $0x348] sm:$0xff] }
 0xfbf   :  { %v4715_v6 = vld [vmem:[%s6493_s4 + $0x288] sm:$0xff] }
 0xfc0   :  { %v4009_v13 = vmul.f32 %v4668_v8, %v4001_v11  ;;  %v4699_v11 = vld [vmem:[%s6493_s4 + $0x208] sm:$0xff] }
 0xfc1   :  { %v5370_v14 = vpop.eup %5369 }
 0xfc2   :  { %v6249_v15 = vadd.f32 %v4669_v12, %v4009_v13  ;;  %v4002_v16 = vmul.f32 %v5370_v14, %v3986_v44  ;;  %v4707_v44 = vld [vmem:[%s6493_s4 + $0x248] sm:$0xff]  ;;  %v4714_v13 = vld [vmem:[%s6493_s4 + $0x280] sm:$0xff] }
 0xfc3   :  { %v4746_v14 = vld [vmem:[%s6493_s4 + $0x380] sm:$0xff] }
 0xfc4   :  { %4694 = vmatmul.mubr.msk.f32.vlgmr.msra.gmra.mxu1 %vm40_vm0, %v6249_v15  ;;  %4696 = vmatmul.mubr.msk.f32.vlgmr.msra.gmra.mxu0 %vm40_vm0, %v6249_v15  ;;  %v4010_v19 = vmul.f32 %v4668_v8, %v4002_v16  ;;  %v4747_v8 = vld [vmem:[%s6493_s4 + $0x388] sm:$0xff]  ;;  %v4698_v16 = vld [vmem:[%s6493_s4 + $0x200] sm:$0xff] }
 0xfc5   :  { %4132 = vmatprep.mubr.f32.mxu1 %v5397_v10  ;;  %4209 = vmatprep.mubr.f32.mxu0 %v5397_v10  ;;  %v4759_v10 = vld [vmem:[%s6493_s4 + $0x3e8] sm:$0xff] }
 0xfc6   :  { %v6269_v24 = vadd.f32 %v4669_v12, %v4010_v19  ;;  %4957 = vmatpush3.msra.mxu1 %v4713_v17  ;;  %4995 = vmatpush3.msra.mxu0 %v4745_v18  ;;  %v4731_v12 = vld [vmem:[%s6493_s4 + $0x308] sm:$0xff]  ;;  %v4730_v17 = vld [vmem:[%s6493_s4 + $0x300] sm:$0xff]  ;;  %v4692_v19 = vld [vmem:[%s6492_s3 + $0x130] ss:$0 sm:$0xff] }
 0xfc7   :  { %4958 = vmatprep.subr.mxu1 %v4728_v21  ;;  %4996 = vmatprep.subr.mxu0 %v4760_v22  ;;  %v4690_v18 = vld [vmem:[%s6492_s3 + $0x120] ss:$0 sm:$0xff] }
 0xfc8   :  { %4695 = vmatmul.mubr.msk.f32.gmra.mxu1 %vm40_vm0, %v6269_v24  ;;  %4697 = vmatmul.mubr.msk.f32.gmra.mxu0 %vm40_vm0, %v6269_v24 }
 0xfc9   :  { %4959 = vmatpush3.msra.mxu1 %v4712_v25  ;;  %4997 = vmatpush3.msra.mxu0 %v4744_v26  ;;  %v4691_v25 = vld [vmem:[%s6492_s3 + $0x128] ss:$0 sm:$0xff]  ;;  %v4693_v26 = vld [vmem:[%s6492_s3 + $0x138] ss:$0 sm:$0xff] }
 0xfca   :  { %4960 = vmatprep.subr.mxu1 %v4727_v27  ;;  %4998 = vmatprep.subr.mxu0 %v4759_v10 }
 0xfcb   :  { %4961 = vmatpush3.msra.mxu1 %v4711_v28  ;;  %4999 = vmatpush3.msra.mxu0 %v4743_v29 }
 0xfcc   :  { %4962 = vmatprep.subr.mxu1 %v4726_v32  ;;  %5000 = vmatprep.subr.mxu0 %v4758_v30 }
 0xfcd   :  { %4963 = vmatpush3.msra.mxu1 %v4710_v31  ;;  %5001 = vmatpush3.msra.mxu0 %v4742_v40 }
 0xfce   :  { %4964 = vmatprep.subr.mxu1 %v4725_v33  ;;  %5002 = vmatprep.subr.mxu0 %v4757_v34 }
 0xfcf   :  { %4965 = vmatpush3.msra.mxu1 %v4709_v35  ;;  %5003 = vmatpush3.msra.mxu0 %v4741_v36 }
 0xfd0   :  { %4966 = vmatprep.subr.mxu1 %v4724_v37  ;;  %5004 = vmatprep.subr.mxu0 %v4756_v23 }
 0xfd1   :  { %4967 = vmatpush3.msra.mxu1 %v4708_v20  ;;  %5005 = vmatpush3.msra.mxu0 %v4740_v38 }
 0xfd2   :  { %4968 = vmatprep.subr.mxu1 %v4723_v42  ;;  %5006 = vmatprep.subr.mxu0 %v4755_v43 }
 0xfd3   :  { %4969 = vmatpush3.msra.mxu1 %v4707_v44  ;;  %5007 = vmatpush3.msra.mxu0 %v4739_v45 }
 0xfd4   :  { %4970 = vmatprep.subr.mxu1 %v4722_v46  ;;  %5008 = vmatprep.subr.mxu0 %v4754_v57 }
 0xfd5   :  { %4971 = vmatpush3.msra.mxu1 %v4706_v47  ;;  %5009 = vmatpush3.msra.mxu0 %v4738_v55 }
 0xfd6   :  { %4972 = vmatprep.subr.mxu1 %v4721_v48  ;;  %5010 = vmatprep.subr.mxu0 %v4753_v49 }
 0xfd7   :  { %4973 = vmatpush3.msra.mxu1 %v4705_v50  ;;  %5011 = vmatpush3.msra.mxu0 %v4737_v51 }
 0xfd8   :  { %4974 = vmatprep.subr.mxu1 %v4720_v52  ;;  %5012 = vmatprep.subr.mxu0 %v4752_v53 }
 0xfd9   :  { %4975 = vmatpush3.msra.mxu1 %v4704_v54  ;;  %5013 = vmatpush3.msra.mxu0 %v4736_v39 }
 0xfda   :  { %4976 = vmatprep.subr.mxu1 %v4719_v41  ;;  %5014 = vmatprep.subr.mxu0 %v4751_v56  ;;  %v4763_v56 = vld [vmem:[%s6494_s5 + $0xd] ss:$0 sm:$0xff] }
 0xfdb   :  { %4977 = vmatpush3.msra.mxu1 %v4703_v58  ;;  %5015 = vmatpush3.msra.mxu0 %v4735_v59 }
 0xfdc   :  { %4978 = vmatprep.subr.mxu1 %v4718_v60  ;;  %5016 = vmatprep.subr.mxu0 %v4750_v61 }
 0xfdd   :  { %4979 = vmatpush3.msra.mxu1 %v4702_v9  ;;  %5017 = vmatpush3.msra.mxu0 %v4734_v62 }
 0xfde   :  { %4980 = vmatprep.subr.mxu1 %v4717_v7  ;;  %5018 = vmatprep.subr.mxu0 %v4749_v63 }
 0xfdf   :  { %4981 = vmatpush3.msra.mxu1 %v4701_v0  ;;  %5019 = vmatpush3.msra.mxu0 %v4733_v1  ;;  %v5405_v1 = vmov 0  }
 0xfe0   :  { %4982 = vmatprep.subr.mxu1 %v4716_v2  ;;  %5020 = vmatprep.subr.mxu0 %v4748_v3  ;;  %v4498_v2 = vld [vmem:[%s6495_s6 + $0x8] sm:$0x1] }
 0xfe1   :  { %4983 = vmatpush3.msra.mxu1 %v4700_v4  ;;  %5021 = vmatpush3.msra.mxu0 %v4732_v5  ;;  %5280 = vpush %v4498_v2 }
 0xfe2   :  { %4984 = vmatprep.subr.mxu1 %v4715_v6  ;;  %5022 = vmatprep.subr.mxu0 %v4747_v8 }
 0xfe3   :  { %4985 = vmatpush3.msra.mxu1 %v4699_v11  ;;  %5023 = vmatpush3.msra.mxu0 %v4731_v12 }
 0xfe4   :  { %4986 = vmatprep.subr.mxu1 %v4714_v13  ;;  %5024 = vmatprep.subr.mxu0 %v4746_v14  ;;  %v4497_v14 = vld [vmem:[%s6495_s6] sm:$0xff]  ;;  %s5406_s6 = smov [#allocation2]  }
 0xfe5   :  { %4987 = vmatpush3.msra.mxu1 %v4698_v16  ;;  %5025 = vmatpush3.msra.mxu0 %v4730_v17  ;;  %s4534_s26 = sshll.u32 %s5406_s6, 4  ;;  %s4535_s26 = int_to_ptr.vmem [resolvable:$true] %s4534_s26 }
 0xfe6   :  { %5293 = vset.pattern.permute.xlu1 %v5405_v1  ;;  %5294 = vset.pattern.permute.xlu0 %v5405_v1  ;;  %s5375_s27 = scalar_lea.vmem %s4535_s26, 32  ;;  %p5380_p1 = scmp.lt.s32.totalorder %s4535_s26, %s4535_s26 }
 0xfe7   :  { %p5376_p0 = scmp.ne.s32.totalorder %s4535_s26, %s5375_s27  ;;  %p5381_p2 = scmp.lt.s32.totalorder %s5375_s27, %s5375_s27 }
 0xfe9   :  { %p5382_p3 = por %p5381_p2, %p5380_p1 }
 0xfeb   :  { %p5383_p4 = pnand %p5382_p3, %p5376_p0 }
0x1084   :  { %v4128_v21 = vpop.f32.mrf.mxu1  ;;  %v4205_v22 = vpop.f32.mrf.mxu0 }
0x1085   :  { %v4129_v27 = vadd.f32 %v4690_v18, %v4128_v21  ;;  %v4206_v10 = vadd.f32 %v4692_v19, %v4205_v22 }
0x1086   :  { %v4130_v28 = vpop.f32.mrf.mxu1  ;;  %v4207_v29 = vpop.f32.mrf.mxu0 }
0x1087   :  { %v4131_v32 = vadd.f32 %v4691_v25, %v4130_v28  ;;  %v4208_v30 = vadd.f32 %v4693_v26, %v4207_v29  ;;  %v4216_v35 = vmax.f32 %v4129_v27, 0.0  ;;  %v4218_v36 = vmax.f32 %v4206_v10, 0.0  ;;  %v4767_v10 = vld [vmem:[%s6494_s5 + $0x11] ss:$0 sm:$0xff] }
0x1088   :  { %v4134_v31 = vpop.f32.mrf.mxu1  ;;  %v4211_v40 = vpop.f32.mrf.mxu0 }
0x1089   :  { %v4217_v33 = vmax.f32 %v4131_v32, 0.0  ;;  %v4219_v34 = vmax.f32 %v4208_v30, 0.0  ;;  %v4135_v37 = vadd.f32 %v4690_v18, %v4134_v31  ;;  %v4212_v23 = vadd.f32 %v4692_v19, %v4211_v40 }
0x108a   :  { %v4136_v20 = vpop.f32.mrf.mxu1  ;;  %v4213_v38 = vpop.f32.mrf.mxu0 }
0x108b   :  { %v4137_v42 = vadd.f32 %v4691_v25, %v4136_v20  ;;  %v4214_v43 = vadd.f32 %v4693_v26, %v4213_v38  ;;  %4353 = vmatprep.mubr.f32.mxu1 %v4217_v33  ;;  %4428 = vmatprep.mubr.f32.mxu0 %v4219_v34  ;;  %v4220_v46 = vmax.f32 %v4135_v37, 0.0  ;;  %v4222_v57 = vmax.f32 %v4212_v23, 0.0  ;;  %v4766_v26 = vld [vmem:[%s6494_s5 + $0x10] ss:$0 sm:$0xff]  ;;  %s5281_s5 = spop %5280 }
0x108c   :  { %4354 = vmatmul.mubr.f32.vlgmr.msra.gmra.mxu1 %v4216_v35  ;;  %4429 = vmatmul.mubr.f32.vlgmr.msra.gmra.mxu0 %v4218_v36 }
0x108d   :  { %v4221_v44 = vmax.f32 %v4137_v42, 0.0  ;;  %v4223_v45 = vmax.f32 %v4214_v43, 0.0 }
0x108f   :  { %4358 = vmatprep.mubr.f32.mxu1 %v4221_v44  ;;  %4433 = vmatprep.mubr.f32.mxu0 %v4223_v45 }
0x1090   :  { %4359 = vmatmul.mubr.f32.gmra.mxu1 %v4220_v46  ;;  %4434 = vmatmul.mubr.f32.gmra.mxu0 %v4222_v57  ;;  %v4522_v57 = vstv %s5281_s5 }
0x114c   :  { %v4988_v47 = vpop.f32.mrf.mxu1  ;;  %v5026_v55 = vpop.f32.mrf.mxu0 }
0x114e   :  { %v4989_v48 = vpop.f32.mrf.mxu1  ;;  %v5027_v49 = vpop.f32.mrf.mxu0 }
0x114f   :  { %v4990_v50 = vadd.f32 %v4989_v48, %v4988_v47  ;;  %v5028_v51 = vadd.f32 %v5027_v49, %v5026_v55 }
0x1150   :  { %v4991_v52 = vpop.f32.mrf.mxu1  ;;  %v5029_v53 = vpop.f32.mrf.mxu0 }
0x1151   :  { %v4431_v54 = vadd.f32 %v5028_v51, %v4990_v50 }
0x1152   :  { %v4992_v39 = vpop.f32.mrf.mxu1  ;;  %v5030_v41 = vpop.f32.mrf.mxu0 }
0x1153   :  { %v4993_v58 = vadd.f32 %v4992_v39, %v4991_v52  ;;  %v5031_v59 = vadd.f32 %v5030_v41, %v5029_v53  ;;  %v4439_v60 = vadd.f32 %v4431_v54, %v6249_v15 }
0x1155   :  { %v4436_v61 = vadd.f32 %v5031_v59, %v4993_v58  ;;  %v4449_v9 = vadd.f32 %v4763_v56, %v4439_v60 }
0x1157   :  { %v4455_v62 = vsel %vm40_vm0, %v4449_v9, 0.0  ;;  %v4440_v7 = vadd.f32 %v4436_v61, %v6269_v24 }
0x1158   :  { %4456 = vadd.xlane.f32.xlu1 %v4455_v62 }
0x1159   :  { %v4450_v63 = vadd.f32 %v4763_v56, %v4440_v7 }
0x115b   :  { %v4458_v0 = vsel %vm40_vm0, %v4450_v63, 0.0 }
0x115c   :  { %4459 = vadd.xlane.f32.xlu0 %v4458_v0 }
0x11e1   :  { %v4457_v15 = vpop.xlane.xlu1 %4456 }
0x11e2   :  { %v4461_v3 = vmul.f32 0.03125, %v4457_v15 }
0x11e4   :  { %v4463_v4 = vsub.f32 %v4449_v9, %v4461_v3 }
0x11e5   :  { %v4460_v5 = vpop.xlane.xlu0 %4459 }
0x11e6   :  { %v4462_v6 = vmul.f32 0.03125, %v4460_v5  ;;  %v4465_v8 = vmul.f32 %v4463_v4, %v4463_v4 }
0x11e8   :  { %v4464_v24 = vsub.f32 %v4450_v63, %v4462_v6  ;;  %v4467_v11 = vsel %vm40_vm0, %v4465_v8, 0.0 }
0x11e9   :  { %4468 = vadd.xlane.f32.xlu1 %v4467_v11 }
0x11ea   :  { %v4466_v12 = vmul.f32 %v4464_v24, %v4464_v24 }
0x11ec   :  { %v4470_v13 = vsel %vm40_vm0, %v4466_v12, 0.0 }
0x11ed   :  { %4471 = vadd.xlane.f32.xlu0 %v4470_v13 }
0x11fa   :  { %4501 = vperm.xlu1 %5293, %v4497_v14  }
0x1272   :  { %v4469_v16 = vpop.xlane.xlu1 %4468 }
0x1273   :  { %v4473_v17 = vmul.f32 0.03125, %v4469_v16 }
0x1275   :  { %v4475_v18 = vadd.f32 1e-05, %v4473_v17 }
0x1276   :  { %v4472_v19 = vpop.xlane.xlu0 %4471  ;;  %v4502_v32 = vpop.permute.xlu1 %4501 }
0x1277   :  { %5371 = vrsqrt.f32 %v4475_v18  ;;  %v4474_v21 = vmul.f32 0.03125, %v4472_v19 }
0x1279   :  { %v4476_v22 = vadd.f32 1e-05, %v4474_v21 }
0x127b   :  { %5373 = vrsqrt.f32 %v4476_v22 }
0x1284   :  { %v5372_v25 = vpop.eup %5371 }
0x1285   :  { %v4479_v27 = vmul.f32 %v5372_v25, %v4463_v4 }
0x1287   :  { %v4487_v28 = vmul.f32 %v4766_v26, %v4479_v27 }
0x1288   :  { %v5374_v29 = vpop.eup %5373 }
0x1289   :  { %v4495_v30 = vadd.f32 %v4767_v10, %v4487_v28  ;;  %v4480_v31 = vmul.f32 %v5374_v29, %v4464_v24 }
0x128b   :  { %v4488_v40 = vmul.f32 %v4766_v26, %v4480_v31  ;;  %v4504_v33 = vmul.f32 %v4502_v32, %v4495_v30 }
0x128d   :  { %v4496_v34 = vadd.f32 %v4767_v10, %v4488_v40  ;;  %v4506_v35 = vsel %vm40_vm0, %v4504_v33, 0.0 }
0x128e   :  { %v4507_v36 = vrot.slane %v4506_v35, 4 }
0x128f   :  { %v4505_v37 = vmul.f32 %v4502_v32, %v4496_v34 }
0x1290   :  { %v4508_v23 = vadd.f32 %v4507_v36, %v4506_v35 }
0x1291   :  { %v4513_v20 = vsel %vm40_vm0, %v4505_v37, 0.0 }
0x1292   :  { %v4509_v38 = vrot.slane %v4508_v23, 2  ;;  %v4514_v42 = vrot.slane %v4513_v20, 4 }
0x1294   :  { %v4515_v43 = vadd.f32 %v4514_v42, %v4513_v20  ;;  %v4510_v44 = vadd.f32 %v4509_v38, %v4508_v23 }
0x1296   :  { %v4516_v45 = vrot.slane %v4515_v43, 2  ;;  %v4511_v46 = vrot.slane %v4510_v44, 1 }
0x1298   :  { %v4512_v47 = vadd.f32 %v4511_v46, %v4510_v44  ;;  %v4517_v55 = vadd.f32 %v4516_v45, %v4515_v43 }
0x129a   :  { %v4518_v48 = vrot.slane %v4517_v55, 1  ;;  %v4524_v49 = vadd.f32 %v4522_v57, %v4512_v47 }
0x129c   :  { %v4519_v50 = vadd.f32 %v4518_v48, %v4517_v55  ;;  %4527 = vst.msk [vmem:[#allocation2] sm:$0x1] %vm4526_vm5, %v4524_v49 }
0x129e   :  { %v4525_v51 = vadd.f32 %v4522_v57, %v4519_v50 }
0x12a0   :  { %4528 = vst.msk [vmem:[#allocation2 + $0x1] sm:$0x1] %vm4526_vm5, %v4525_v51 }
0x12a1   :  { %5386 = shalt.err (!%p5383_p4)
}
0x12a2   :  { %s5407_s28 = smov 1  }
0x12a3   :  { %4540 = dma.vmem_to_hbm [thread:$0]  %s4535_s26, 32, %s6496_s7, [#allocation3], %s5403_s22, %s5403_s22, %s5407_s28  }
0x12a4   :  { %5395 = dma.done.wait [#allocation3], 32  }
0x12a5   :  { %5396 = vsyncadd [#allocation3], 4294967264 }
0x12a6   :  { %4544 = vsyncpa [#allocation3], 1 }

</bundles_post_ra>
